<compile_context>
chip_gen: v7x
topology: tpu7x:2x2x1
jax: 0.10.0
libtpu: 0.0.40
codegen_flags: <defaults>
</compile_context>

<pallas_src>
import functools

import jax
import jax.numpy as jnp
from jax.experimental import pallas as pl
from jax.experimental.pallas import tpu as pltpu


# ----------------------------- in-kernel helpers --------------------------------

def _conv_row(x_ref, w_ref, dc, *, stride, Hc, Wc, Cin, Cout):
    """f32 3x3x3 conv output (no bias) for one conv-output depth slice `dc`.

    x_ref : (1, D+2, H+2, W+2, Cin)  zero-padded input block (compute dtype)
    w_ref : (3, 3, 3*Cin, Cout)      weights with the kw tap folded into K
    returns (Hc*Wc, Cout) float32
    """
    h_span = stride * (Hc - 1) + 1
    w_span = stride * (Wc - 1) + 1
    acc = jnp.zeros((Hc * Wc, Cout), jnp.float32)
    for kd in range(3):
        # One padded depth slab; dynamic scalar index (no strided ref slicing).
        slab = x_ref[0, dc * stride + kd]                       # (H+2, W+2, Cin)
        for kh in range(3):
            rows = slab[kh:kh + h_span:stride]                  # (Hc, W+2, Cin)
            # Fold the three kw taps into the contraction dim -> K = 3*Cin.
            taps = [rows[:, kw:kw + w_span:stride, :] for kw in range(3)]
            patch = jnp.concatenate(taps, axis=-1)              # (Hc, Wc, 3*Cin)
            patch = patch.reshape(Hc * Wc, 3 * Cin)
            acc = acc + jnp.dot(patch, w_ref[kd, kh],
                                preferred_element_type=jnp.float32)
    return acc


def _pool_hw(v, Ho, Wo):
    """2x2 ceil-mode max pool over the leading (H, W) axes of a (Hc, Wc, C) value."""
    Hc, Wc, C = v.shape
    if (2 * Ho != Hc) or (2 * Wo != Wc):            # only emitted for odd Hc / Wc
        v = jnp.pad(v, ((0, 2 * Ho - Hc), (0, 2 * Wo - Wc), (0, 0)),
                    constant_values=-jnp.inf)
    return v.reshape(Ho, 2, Wo, 2, C).max(axis=(1, 3))


# ----------------------------------- kernels ------------------------------------

def _conv_pool_kernel(x_ref, w_ref, b_ref, o_ref, *,
                      stride, Dc, Hc, Wc, Ho, Wo, Cin, Cout):
    """conv(3x3x3, pad=1, stride) + bias + MaxPool3d(k=2, ceil_mode=True), one pooled
    output depth row per grid step."""
    t = pl.program_id(1)                            # pooled output depth index
    dc0 = 2 * t

    row0 = _conv_row(x_ref, w_ref, dc0, stride=stride,
                     Hc=Hc, Wc=Wc, Cin=Cin, Cout=Cout)
    p0 = _pool_hw(row0.reshape(Hc, Wc, Cout), Ho, Wo)

    if Dc % 2 == 0:                                 # second conv row always valid
        row1 = _conv_row(x_ref, w_ref, dc0 + 1, stride=stride,
                         Hc=Hc, Wc=Wc, Cin=Cin, Cout=Cout)
        p1 = _pool_hw(row1.reshape(Hc, Wc, Cout), Ho, Wo)
    else:                                           # ceil_mode: last window covers 1 row
        dc1 = jnp.minimum(dc0 + 1, Dc - 1)          # clamp to stay in bounds
        row1 = _conv_row(x_ref, w_ref, dc1, stride=stride,
                         Hc=Hc, Wc=Wc, Cin=Cin, Cout=Cout)
        p1 = _pool_hw(row1.reshape(Hc, Wc, Cout), Ho, Wo)
        p1 = jnp.where(dc0 + 1 < Dc, p1, -jnp.inf)

    # Per-channel bias commutes with the max, so add it once after pooling.
    p = jnp.maximum(p0, p1) + b_ref[...]
    o_ref[...] = p.reshape(1, 1, Ho, Wo * Cout).astype(o_ref.dtype)


def _conv_kernel(x_ref, w_ref, b_ref, o_ref, *, stride, Hc, Wc, Cin, Cout):
    """conv(3x3x3, pad=1, stride) + bias, one conv output depth row per grid step."""
    t = pl.program_id(1)                            # conv output depth index
    row = _conv_row(x_ref, w_ref, t, stride=stride,
                    Hc=Hc, Wc=Wc, Cin=Cin, Cout=Cout) + b_ref[...]
    o_ref[...] = row.reshape(1, 1, Hc, Wc * Cout).astype(o_ref.dtype)


# ----------------------------------- wrapper -------------------------------------

def encoder_forward(x_ncdhw, params, *, do_pooling=True, stride=1,
                    compute_dtype=jnp.bfloat16):
    """Equivalent of encoder.forward(x) for NCDHW input."""
    N, Cin, D, H, W = x_ncdhw.shape
    w, b = params["w"], params["b"]
    Cout = w.shape[-1]
    out_dtype = x_ncdhw.dtype

    # Conv output extent for kernel=3, pad=1, stride=s.
    Dc = (D - 1) // stride + 1
    Hc = (H - 1) // stride + 1
    Wc = (W - 1) // stride + 1
    if do_pooling:
        Do, Ho, Wo = -(-Dc // 2), -(-Hc // 2), -(-Wc // 2)
    else:
        Do, Ho, Wo = Dc, Hc, Wc
    lane_w = Wo * Cout                               # lane-dense flattened last dim

    # Boundary glue: NCDHW -> NDHWC, bf16 cast for the MXU, +1 spatial halo.
    # TODO(synk): fold the halo pad into the kernel (boundary-tap masking) and keep the whole
    # network channels-last so the pad/transpose HBM passes disappear for stacked layers.
    x = jnp.transpose(x_ncdhw, (0, 2, 3, 4, 1)).astype(compute_dtype)
    xp = jnp.pad(x, ((0, 0), (1, 1), (1, 1), (1, 1), (0, 0)))
    wk = w.reshape(3, 3, 3 * Cin, Cout).astype(compute_dtype)   # kw folded into K
    b2 = b.reshape(1, Cout).astype(jnp.float32)

    if do_pooling:
        kernel = functools.partial(_conv_pool_kernel, stride=stride, Dc=Dc,
                                   Hc=Hc, Wc=Wc, Ho=Ho, Wo=Wo, Cin=Cin, Cout=Cout)
    else:
        kernel = functools.partial(_conv_kernel, stride=stride,
                                   Hc=Hc, Wc=Wc, Cin=Cin, Cout=Cout)

    out = pl.pallas_call(
        kernel,
        out_shape=jax.ShapeDtypeStruct((N, Do, Ho, lane_w), out_dtype),
        grid_spec=pltpu.PrefetchScalarGridSpec(
            num_scalar_prefetch=0,
            grid=(N, Do),
            in_specs=[
                # Padded volume of batch n stays VMEM-resident across the depth axis
                # (block index only depends on n -> no re-DMA per depth row).
                # TODO(synk): for very large volumes, add D-halo tiling via manual DMA.
                pl.BlockSpec((1, D + 2, H + 2, W + 2, Cin),
                             lambda n, t: (n, 0, 0, 0, 0)),
                pl.BlockSpec((3, 3, 3 * Cin, Cout), lambda n, t: (0, 0, 0, 0)),
                pl.BlockSpec((1, Cout), lambda n, t: (0, 0)),
            ],
            out_specs=pl.BlockSpec((1, 1, Ho, lane_w), lambda n, t: (n, t, 0, 0)),
        ),
        compiler_params=pltpu.CompilerParams(
            dimension_semantics=("parallel", "parallel")),
    )(xp, wk, b2)

    out = out.reshape(N, Do, Ho, Wo, Cout)
    return jnp.transpose(out, (0, 4, 1, 2, 3))       # NDHWC -> NCDHW (boundary glue)


# -------------------------------- init & reference -------------------------------

def init_params(key, in_channels, out_channels):
    kw_, kb = jax.random.split(key)
    fan_in = in_channels * 27
    bound = 1.0 / (fan_in ** 0.5)
    w = jax.random.uniform(kw_, (3, 3, 3, in_channels, out_channels),
                           jnp.float32, -bound, bound)
    b = jax.random.uniform(kb, (out_channels,), jnp.float32, -bound, bound)
    return {"w": w, "b": b}


def _reference(x, params, *, do_pooling, stride, compute_dtype=jnp.bfloat16):
    # Same input rounding as the kernel (bf16 operands, f32 accumulation).
    xr = x.astype(compute_dtype).astype(jnp.float32)
    wr = params["w"].astype(compute_dtype).astype(jnp.float32)
    w_oidhw = jnp.transpose(wr, (4, 3, 0, 1, 2))
    y = jax.lax.conv_general_dilated(
        xr, w_oidhw, window_strides=(stride,) * 3, padding=((1, 1),) * 3,
        dimension_numbers=("NCDHW", "OIDHW", "NCDHW"),
    ) + params["b"][None, :, None, None, None]
    if do_pooling:
        _, _, Dc, Hc, Wc = y.shape
        pads = [(0, 0), (0, 0), (0, Dc % 2), (0, Hc % 2), (0, Wc % 2)]  # ceil_mode
        y = jax.lax.reduce_window(y, -jnp.inf, jax.lax.max,
                                  (1, 1, 2, 2, 2), (1, 1, 2, 2, 2), pads)
    return y


# ------------------------------------- demo --------------------------------------

if __name__ == "__main__":
    key = jax.random.PRNGKey(0)
    k_x, k_p = jax.random.split(key)

    N, Cin, Cout = 2, 4, 8
    params = init_params(k_p, Cin, Cout)

    checks = [
        # (spatial, do_pooling, stride)
        (8, True, 1),    # even dims, fused conv + pool
        (7, True, 1),    # odd dims -> ceil_mode windows in D/H/W
        (8, False, 1),   # conv only (no pooling)
    ]
    for i, (S, do_pooling, stride) in enumerate(checks):
        kx = jax.random.fold_in(k_x, i)
        x = jax.random.normal(kx, (N, Cin, S, S, S), jnp.float32)

        out = jax.block_until_ready(
            encoder_forward(x, params, do_pooling=do_pooling, stride=stride))
        ref = _reference(x, params, do_pooling=do_pooling, stride=stride)

        assert out.shape == ref.shape, (out.shape, ref.shape)
        assert jnp.allclose(out, ref, atol=1e-3, rtol=1e-3), (
            i, float(jnp.max(jnp.abs(out - ref))))

    print("KERNEL_OK")
</pallas_src>

<mosaic_0001>
module attributes {stable_mosaic.version = 11 : i64} {
  func.func @_conv_pool_kernel(%arg0: i32, %arg1: i32, %arg2: memref<1x10x10x10x4xbf16, #tpu.memory_space<vmem>>, %arg3: memref<3x3x12x8xbf16, #tpu.memory_space<vmem>>, %arg4: memref<1x8xf32, #tpu.memory_space<vmem>>, %arg5: memref<1x1x4x32xf32, #tpu.memory_space<vmem>>) attributes {dimension_semantics = [#tpu.dimension_semantics<parallel>, #tpu.dimension_semantics<parallel>], iteration_bounds = array<i64: 2, 4>, scalar_prefetch = 0 : i64, scratch_operands = 0 : i64, tpu.core_type = #tpu.core_type<tc>, window_params = [{transform_indices = @transform_0, window_bounds = array<i64: 1, 10, 10, 10, 4>}, {pipeline_mode = #tpu.pipeline_mode<synchronous>, transform_indices = @transform_1, window_bounds = array<i64: 3, 3, 12, 8>}, {pipeline_mode = #tpu.pipeline_mode<synchronous>, transform_indices = @transform_2, window_bounds = array<i64: 1, 8>}, {transform_indices = @transform_3, window_bounds = array<i64: 1, 1, 4, 32>}]} {
    %c2_i32 = arith.constant 2 : i32
    %0 = arith.muli %c2_i32, %arg1 : i32
    %cst = arith.constant 0.000000e+00 : f32
    %1 = vector.broadcast %cst : f32 to vector<64x8xf32>
    %c1_i32 = arith.constant 1 : i32
    %2 = arith.muli %0, %c1_i32 : i32
    %c0_i32 = arith.constant 0 : i32
    %3 = arith.addi %2, %c0_i32 : i32
    %c0 = arith.constant 0 : index
    %4 = arith.index_cast %3 : i32 to index
    %c0_0 = arith.constant 0 : index
    %c0_1 = arith.constant 0 : index
    %c0_2 = arith.constant 0 : index
    %5 = vector.load %arg2[%c0, %4, %c0_0, %c0_1, %c0_2] : memref<1x10x10x10x4xbf16, #tpu.memory_space<vmem>>, vector<1x1x10x10x4xbf16>
    %6 = vector.shape_cast %5 : vector<1x1x10x10x4xbf16> to vector<10x10x4xbf16>
    %7 = vector.extract_strided_slice %6 {offsets = [0, 0, 0], sizes = [8, 10, 4], strides = [1, 1, 1]} : vector<10x10x4xbf16> to vector<8x10x4xbf16>
    %8 = vector.extract_strided_slice %7 {offsets = [0, 0, 0], sizes = [8, 8, 4], strides = [1, 1, 1]} : vector<8x10x4xbf16> to vector<8x8x4xbf16>
    %9 = vector.extract_strided_slice %7 {offsets = [0, 1, 0], sizes = [8, 8, 4], strides = [1, 1, 1]} : vector<8x10x4xbf16> to vector<8x8x4xbf16>
    %10 = vector.extract_strided_slice %7 {offsets = [0, 2, 0], sizes = [8, 8, 4], strides = [1, 1, 1]} : vector<8x10x4xbf16> to vector<8x8x4xbf16>
    %11 = tpu.concatenate %8, %9, %10 in 2 : vector<8x8x4xbf16>, vector<8x8x4xbf16>, vector<8x8x4xbf16> -> vector<8x8x12xbf16>
    %12 = vector.shape_cast %11 : vector<8x8x12xbf16> to vector<64x12xbf16>
    %c0_3 = arith.constant 0 : index
    %c0_4 = arith.constant 0 : index
    %c0_5 = arith.constant 0 : index
    %c0_6 = arith.constant 0 : index
    %13 = vector.load %arg3[%c0_3, %c0_4, %c0_5, %c0_6] : memref<3x3x12x8xbf16, #tpu.memory_space<vmem>>, vector<1x1x12x8xbf16>
    %14 = vector.shape_cast %13 : vector<1x1x12x8xbf16> to vector<12x8xbf16>
    %cst_7 = arith.constant dense<0.000000e+00> : vector<64x8xf32>
    %15 = tpu.matmul %12, %14, %cst_7 {dimension_numbers = #tpu.dot_dimension_numbers<[1], [0], [0], [1], [0, 0, 1, 1], [], []>} : vector<64x12xbf16>, vector<12x8xbf16>, vector<64x8xf32> -> vector<64x8xf32>
    %16 = arith.addf %1, %15 : vector<64x8xf32>
    %17 = vector.extract_strided_slice %6 {offsets = [1, 0, 0], sizes = [8, 10, 4], strides = [1, 1, 1]} : vector<10x10x4xbf16> to vector<8x10x4xbf16>
    %18 = vector.extract_strided_slice %17 {offsets = [0, 0, 0], sizes = [8, 8, 4], strides = [1, 1, 1]} : vector<8x10x4xbf16> to vector<8x8x4xbf16>
    %19 = vector.extract_strided_slice %17 {offsets = [0, 1, 0], sizes = [8, 8, 4], strides = [1, 1, 1]} : vector<8x10x4xbf16> to vector<8x8x4xbf16>
    %20 = vector.extract_strided_slice %17 {offsets = [0, 2, 0], sizes = [8, 8, 4], strides = [1, 1, 1]} : vector<8x10x4xbf16> to vector<8x8x4xbf16>
    %21 = tpu.concatenate %18, %19, %20 in 2 : vector<8x8x4xbf16>, vector<8x8x4xbf16>, vector<8x8x4xbf16> -> vector<8x8x12xbf16>
    %22 = vector.shape_cast %21 : vector<8x8x12xbf16> to vector<64x12xbf16>
    %c0_8 = arith.constant 0 : index
    %c1 = arith.constant 1 : index
    %c0_9 = arith.constant 0 : index
    %c0_10 = arith.constant 0 : index
    %23 = vector.load %arg3[%c0_8, %c1, %c0_9, %c0_10] : memref<3x3x12x8xbf16, #tpu.memory_space<vmem>>, vector<1x1x12x8xbf16>
    %24 = vector.shape_cast %23 : vector<1x1x12x8xbf16> to vector<12x8xbf16>
    %cst_11 = arith.constant dense<0.000000e+00> : vector<64x8xf32>
    %25 = tpu.matmul %22, %24, %cst_11 {dimension_numbers = #tpu.dot_dimension_numbers<[1], [0], [0], [1], [0, 0, 1, 1], [], []>} : vector<64x12xbf16>, vector<12x8xbf16>, vector<64x8xf32> -> vector<64x8xf32>
    %26 = arith.addf %16, %25 : vector<64x8xf32>
    %27 = vector.extract_strided_slice %6 {offsets = [2, 0, 0], sizes = [8, 10, 4], strides = [1, 1, 1]} : vector<10x10x4xbf16> to vector<8x10x4xbf16>
    %28 = vector.extract_strided_slice %27 {offsets = [0, 0, 0], sizes = [8, 8, 4], strides = [1, 1, 1]} : vector<8x10x4xbf16> to vector<8x8x4xbf16>
    %29 = vector.extract_strided_slice %27 {offsets = [0, 1, 0], sizes = [8, 8, 4], strides = [1, 1, 1]} : vector<8x10x4xbf16> to vector<8x8x4xbf16>
    %30 = vector.extract_strided_slice %27 {offsets = [0, 2, 0], sizes = [8, 8, 4], strides = [1, 1, 1]} : vector<8x10x4xbf16> to vector<8x8x4xbf16>
    %31 = tpu.concatenate %28, %29, %30 in 2 : vector<8x8x4xbf16>, vector<8x8x4xbf16>, vector<8x8x4xbf16> -> vector<8x8x12xbf16>
    %32 = vector.shape_cast %31 : vector<8x8x12xbf16> to vector<64x12xbf16>
    %c0_12 = arith.constant 0 : index
    %c2 = arith.constant 2 : index
    %c0_13 = arith.constant 0 : index
    %c0_14 = arith.constant 0 : index
    %33 = vector.load %arg3[%c0_12, %c2, %c0_13, %c0_14] : memref<3x3x12x8xbf16, #tpu.memory_space<vmem>>, vector<1x1x12x8xbf16>
    %34 = vector.shape_cast %33 : vector<1x1x12x8xbf16> to vector<12x8xbf16>
    %cst_15 = arith.constant dense<0.000000e+00> : vector<64x8xf32>
    %35 = tpu.matmul %32, %34, %cst_15 {dimension_numbers = #tpu.dot_dimension_numbers<[1], [0], [0], [1], [0, 0, 1, 1], [], []>} : vector<64x12xbf16>, vector<12x8xbf16>, vector<64x8xf32> -> vector<64x8xf32>
    %36 = arith.addf %26, %35 : vector<64x8xf32>
    %c1_i32_16 = arith.constant 1 : i32
    %37 = arith.muli %0, %c1_i32_16 : i32
    %c1_i32_17 = arith.constant 1 : i32
    %38 = arith.addi %37, %c1_i32_17 : i32
    %c0_18 = arith.constant 0 : index
    %39 = arith.index_cast %38 : i32 to index
    %c0_19 = arith.constant 0 : index
    %c0_20 = arith.constant 0 : index
    %c0_21 = arith.constant 0 : index
    %40 = vector.load %arg2[%c0_18, %39, %c0_19, %c0_20, %c0_21] : memref<1x10x10x10x4xbf16, #tpu.memory_space<vmem>>, vector<1x1x10x10x4xbf16>
    %41 = vector.shape_cast %40 : vector<1x1x10x10x4xbf16> to vector<10x10x4xbf16>
    %42 = vector.extract_strided_slice %41 {offsets = [0, 0, 0], sizes = [8, 10, 4], strides = [1, 1, 1]} : vector<10x10x4xbf16> to vector<8x10x4xbf16>
    %43 = vector.extract_strided_slice %42 {offsets = [0, 0, 0], sizes = [8, 8, 4], strides = [1, 1, 1]} : vector<8x10x4xbf16> to vector<8x8x4xbf16>
    %44 = vector.extract_strided_slice %42 {offsets = [0, 1, 0], sizes = [8, 8, 4], strides = [1, 1, 1]} : vector<8x10x4xbf16> to vector<8x8x4xbf16>
    %45 = vector.extract_strided_slice %42 {offsets = [0, 2, 0], sizes = [8, 8, 4], strides = [1, 1, 1]} : vector<8x10x4xbf16> to vector<8x8x4xbf16>
    %46 = tpu.concatenate %43, %44, %45 in 2 : vector<8x8x4xbf16>, vector<8x8x4xbf16>, vector<8x8x4xbf16> -> vector<8x8x12xbf16>
    %47 = vector.shape_cast %46 : vector<8x8x12xbf16> to vector<64x12xbf16>
    %c1_22 = arith.constant 1 : index
    %c0_23 = arith.constant 0 : index
    %c0_24 = arith.constant 0 : index
    %c0_25 = arith.constant 0 : index
    %48 = vector.load %arg3[%c1_22, %c0_23, %c0_24, %c0_25] : memref<3x3x12x8xbf16, #tpu.memory_space<vmem>>, vector<1x1x12x8xbf16>
    %49 = vector.shape_cast %48 : vector<1x1x12x8xbf16> to vector<12x8xbf16>
    %cst_26 = arith.constant dense<0.000000e+00> : vector<64x8xf32>
    %50 = tpu.matmul %47, %49, %cst_26 {dimension_numbers = #tpu.dot_dimension_numbers<[1], [0], [0], [1], [0, 0, 1, 1], [], []>} : vector<64x12xbf16>, vector<12x8xbf16>, vector<64x8xf32> -> vector<64x8xf32>
    %51 = arith.addf %36, %50 : vector<64x8xf32>
    %52 = vector.extract_strided_slice %41 {offsets = [1, 0, 0], sizes = [8, 10, 4], strides = [1, 1, 1]} : vector<10x10x4xbf16> to vector<8x10x4xbf16>
    %53 = vector.extract_strided_slice %52 {offsets = [0, 0, 0], sizes = [8, 8, 4], strides = [1, 1, 1]} : vector<8x10x4xbf16> to vector<8x8x4xbf16>
    %54 = vector.extract_strided_slice %52 {offsets = [0, 1, 0], sizes = [8, 8, 4], strides = [1, 1, 1]} : vector<8x10x4xbf16> to vector<8x8x4xbf16>
    %55 = vector.extract_strided_slice %52 {offsets = [0, 2, 0], sizes = [8, 8, 4], strides = [1, 1, 1]} : vector<8x10x4xbf16> to vector<8x8x4xbf16>
    %56 = tpu.concatenate %53, %54, %55 in 2 : vector<8x8x4xbf16>, vector<8x8x4xbf16>, vector<8x8x4xbf16> -> vector<8x8x12xbf16>
    %57 = vector.shape_cast %56 : vector<8x8x12xbf16> to vector<64x12xbf16>
    %c1_27 = arith.constant 1 : index
    %c1_28 = arith.constant 1 : index
    %c0_29 = arith.constant 0 : index
    %c0_30 = arith.constant 0 : index
    %58 = vector.load %arg3[%c1_27, %c1_28, %c0_29, %c0_30] : memref<3x3x12x8xbf16, #tpu.memory_space<vmem>>, vector<1x1x12x8xbf16>
    %59 = vector.shape_cast %58 : vector<1x1x12x8xbf16> to vector<12x8xbf16>
    %cst_31 = arith.constant dense<0.000000e+00> : vector<64x8xf32>
    %60 = tpu.matmul %57, %59, %cst_31 {dimension_numbers = #tpu.dot_dimension_numbers<[1], [0], [0], [1], [0, 0, 1, 1], [], []>} : vector<64x12xbf16>, vector<12x8xbf16>, vector<64x8xf32> -> vector<64x8xf32>
    %61 = arith.addf %51, %60 : vector<64x8xf32>
    %62 = vector.extract_strided_slice %41 {offsets = [2, 0, 0], sizes = [8, 10, 4], strides = [1, 1, 1]} : vector<10x10x4xbf16> to vector<8x10x4xbf16>
    %63 = vector.extract_strided_slice %62 {offsets = [0, 0, 0], sizes = [8, 8, 4], strides = [1, 1, 1]} : vector<8x10x4xbf16> to vector<8x8x4xbf16>
    %64 = vector.extract_strided_slice %62 {offsets = [0, 1, 0], sizes = [8, 8, 4], strides = [1, 1, 1]} : vector<8x10x4xbf16> to vector<8x8x4xbf16>
    %65 = vector.extract_strided_slice %62 {offsets = [0, 2, 0], sizes = [8, 8, 4], strides = [1, 1, 1]} : vector<8x10x4xbf16> to vector<8x8x4xbf16>
    %66 = tpu.concatenate %63, %64, %65 in 2 : vector<8x8x4xbf16>, vector<8x8x4xbf16>, vector<8x8x4xbf16> -> vector<8x8x12xbf16>
    %67 = vector.shape_cast %66 : vector<8x8x12xbf16> to vector<64x12xbf16>
    %c1_32 = arith.constant 1 : index
    %c2_33 = arith.constant 2 : index
    %c0_34 = arith.constant 0 : index
    %c0_35 = arith.constant 0 : index
    %68 = vector.load %arg3[%c1_32, %c2_33, %c0_34, %c0_35] : memref<3x3x12x8xbf16, #tpu.memory_space<vmem>>, vector<1x1x12x8xbf16>
    %69 = vector.shape_cast %68 : vector<1x1x12x8xbf16> to vector<12x8xbf16>
    %cst_36 = arith.constant dense<0.000000e+00> : vector<64x8xf32>
    %70 = tpu.matmul %67, %69, %cst_36 {dimension_numbers = #tpu.dot_dimension_numbers<[1], [0], [0], [1], [0, 0, 1, 1], [], []>} : vector<64x12xbf16>, vector<12x8xbf16>, vector<64x8xf32> -> vector<64x8xf32>
    %71 = arith.addf %61, %70 : vector<64x8xf32>
    %c1_i32_37 = arith.constant 1 : i32
    %72 = arith.muli %0, %c1_i32_37 : i32
    %c2_i32_38 = arith.constant 2 : i32
    %73 = arith.addi %72, %c2_i32_38 : i32
    %c0_39 = arith.constant 0 : index
    %74 = arith.index_cast %73 : i32 to index
    %c0_40 = arith.constant 0 : index
    %c0_41 = arith.constant 0 : index
    %c0_42 = arith.constant 0 : index
    %75 = vector.load %arg2[%c0_39, %74, %c0_40, %c0_41, %c0_42] : memref<1x10x10x10x4xbf16, #tpu.memory_space<vmem>>, vector<1x1x10x10x4xbf16>
    %76 = vector.shape_cast %75 : vector<1x1x10x10x4xbf16> to vector<10x10x4xbf16>
    %77 = vector.extract_strided_slice %76 {offsets = [0, 0, 0], sizes = [8, 10, 4], strides = [1, 1, 1]} : vector<10x10x4xbf16> to vector<8x10x4xbf16>
    %78 = vector.extract_strided_slice %77 {offsets = [0, 0, 0], sizes = [8, 8, 4], strides = [1, 1, 1]} : vector<8x10x4xbf16> to vector<8x8x4xbf16>
    %79 = vector.extract_strided_slice %77 {offsets = [0, 1, 0], sizes = [8, 8, 4], strides = [1, 1, 1]} : vector<8x10x4xbf16> to vector<8x8x4xbf16>
    %80 = vector.extract_strided_slice %77 {offsets = [0, 2, 0], sizes = [8, 8, 4], strides = [1, 1, 1]} : vector<8x10x4xbf16> to vector<8x8x4xbf16>
    %81 = tpu.concatenate %78, %79, %80 in 2 : vector<8x8x4xbf16>, vector<8x8x4xbf16>, vector<8x8x4xbf16> -> vector<8x8x12xbf16>
    %82 = vector.shape_cast %81 : vector<8x8x12xbf16> to vector<64x12xbf16>
    %c2_43 = arith.constant 2 : index
    %c0_44 = arith.constant 0 : index
    %c0_45 = arith.constant 0 : index
    %c0_46 = arith.constant 0 : index
    %83 = vector.load %arg3[%c2_43, %c0_44, %c0_45, %c0_46] : memref<3x3x12x8xbf16, #tpu.memory_space<vmem>>, vector<1x1x12x8xbf16>
    %84 = vector.shape_cast %83 : vector<1x1x12x8xbf16> to vector<12x8xbf16>
    %cst_47 = arith.constant dense<0.000000e+00> : vector<64x8xf32>
    %85 = tpu.matmul %82, %84, %cst_47 {dimension_numbers = #tpu.dot_dimension_numbers<[1], [0], [0], [1], [0, 0, 1, 1], [], []>} : vector<64x12xbf16>, vector<12x8xbf16>, vector<64x8xf32> -> vector<64x8xf32>
    %86 = arith.addf %71, %85 : vector<64x8xf32>
    %87 = vector.extract_strided_slice %76 {offsets = [1, 0, 0], sizes = [8, 10, 4], strides = [1, 1, 1]} : vector<10x10x4xbf16> to vector<8x10x4xbf16>
    %88 = vector.extract_strided_slice %87 {offsets = [0, 0, 0], sizes = [8, 8, 4], strides = [1, 1, 1]} : vector<8x10x4xbf16> to vector<8x8x4xbf16>
    %89 = vector.extract_strided_slice %87 {offsets = [0, 1, 0], sizes = [8, 8, 4], strides = [1, 1, 1]} : vector<8x10x4xbf16> to vector<8x8x4xbf16>
    %90 = vector.extract_strided_slice %87 {offsets = [0, 2, 0], sizes = [8, 8, 4], strides = [1, 1, 1]} : vector<8x10x4xbf16> to vector<8x8x4xbf16>
    %91 = tpu.concatenate %88, %89, %90 in 2 : vector<8x8x4xbf16>, vector<8x8x4xbf16>, vector<8x8x4xbf16> -> vector<8x8x12xbf16>
    %92 = vector.shape_cast %91 : vector<8x8x12xbf16> to vector<64x12xbf16>
    %c2_48 = arith.constant 2 : index
    %c1_49 = arith.constant 1 : index
    %c0_50 = arith.constant 0 : index
    %c0_51 = arith.constant 0 : index
    %93 = vector.load %arg3[%c2_48, %c1_49, %c0_50, %c0_51] : memref<3x3x12x8xbf16, #tpu.memory_space<vmem>>, vector<1x1x12x8xbf16>
    %94 = vector.shape_cast %93 : vector<1x1x12x8xbf16> to vector<12x8xbf16>
    %cst_52 = arith.constant dense<0.000000e+00> : vector<64x8xf32>
    %95 = tpu.matmul %92, %94, %cst_52 {dimension_numbers = #tpu.dot_dimension_numbers<[1], [0], [0], [1], [0, 0, 1, 1], [], []>} : vector<64x12xbf16>, vector<12x8xbf16>, vector<64x8xf32> -> vector<64x8xf32>
    %96 = arith.addf %86, %95 : vector<64x8xf32>
    %97 = vector.extract_strided_slice %76 {offsets = [2, 0, 0], sizes = [8, 10, 4], strides = [1, 1, 1]} : vector<10x10x4xbf16> to vector<8x10x4xbf16>
    %98 = vector.extract_strided_slice %97 {offsets = [0, 0, 0], sizes = [8, 8, 4], strides = [1, 1, 1]} : vector<8x10x4xbf16> to vector<8x8x4xbf16>
    %99 = vector.extract_strided_slice %97 {offsets = [0, 1, 0], sizes = [8, 8, 4], strides = [1, 1, 1]} : vector<8x10x4xbf16> to vector<8x8x4xbf16>
    %100 = vector.extract_strided_slice %97 {offsets = [0, 2, 0], sizes = [8, 8, 4], strides = [1, 1, 1]} : vector<8x10x4xbf16> to vector<8x8x4xbf16>
    %101 = tpu.concatenate %98, %99, %100 in 2 : vector<8x8x4xbf16>, vector<8x8x4xbf16>, vector<8x8x4xbf16> -> vector<8x8x12xbf16>
    %102 = vector.shape_cast %101 : vector<8x8x12xbf16> to vector<64x12xbf16>
    %c2_53 = arith.constant 2 : index
    %c2_54 = arith.constant 2 : index
    %c0_55 = arith.constant 0 : index
    %c0_56 = arith.constant 0 : index
    %103 = vector.load %arg3[%c2_53, %c2_54, %c0_55, %c0_56] : memref<3x3x12x8xbf16, #tpu.memory_space<vmem>>, vector<1x1x12x8xbf16>
    %104 = vector.shape_cast %103 : vector<1x1x12x8xbf16> to vector<12x8xbf16>
    %cst_57 = arith.constant dense<0.000000e+00> : vector<64x8xf32>
    %105 = tpu.matmul %102, %104, %cst_57 {dimension_numbers = #tpu.dot_dimension_numbers<[1], [0], [0], [1], [0, 0, 1, 1], [], []>} : vector<64x12xbf16>, vector<12x8xbf16>, vector<64x8xf32> -> vector<64x8xf32>
    %106 = arith.addf %96, %105 : vector<64x8xf32>
    %107 = vector.shape_cast %106 : vector<64x8xf32> to vector<8x8x8xf32>
    %108 = vector.shape_cast %107 : vector<8x8x8xf32> to vector<4x2x4x2x8xf32>
    %cst_58 = arith.constant dense<0xFF800000> : vector<4x4x8xf32>
    %109 = vector.multi_reduction <maximumf>, %108, %cst_58 [1, 3] : vector<4x2x4x2x8xf32> to vector<4x4x8xf32>
    %c1_i32_59 = arith.constant 1 : i32
    %110 = arith.addi %0, %c1_i32_59 : i32
    %cst_60 = arith.constant 0.000000e+00 : f32
    %111 = vector.broadcast %cst_60 : f32 to vector<64x8xf32>
    %c1_i32_61 = arith.constant 1 : i32
    %112 = arith.muli %110, %c1_i32_61 : i32
    %c0_i32_62 = arith.constant 0 : i32
    %113 = arith.addi %112, %c0_i32_62 : i32
    %c0_63 = arith.constant 0 : index
    %114 = arith.index_cast %113 : i32 to index
    %c0_64 = arith.constant 0 : index
    %c0_65 = arith.constant 0 : index
    %c0_66 = arith.constant 0 : index
    %115 = vector.load %arg2[%c0_63, %114, %c0_64, %c0_65, %c0_66] : memref<1x10x10x10x4xbf16, #tpu.memory_space<vmem>>, vector<1x1x10x10x4xbf16>
    %116 = vector.shape_cast %115 : vector<1x1x10x10x4xbf16> to vector<10x10x4xbf16>
    %117 = vector.extract_strided_slice %116 {offsets = [0, 0, 0], sizes = [8, 10, 4], strides = [1, 1, 1]} : vector<10x10x4xbf16> to vector<8x10x4xbf16>
    %118 = vector.extract_strided_slice %117 {offsets = [0, 0, 0], sizes = [8, 8, 4], strides = [1, 1, 1]} : vector<8x10x4xbf16> to vector<8x8x4xbf16>
    %119 = vector.extract_strided_slice %117 {offsets = [0, 1, 0], sizes = [8, 8, 4], strides = [1, 1, 1]} : vector<8x10x4xbf16> to vector<8x8x4xbf16>
    %120 = vector.extract_strided_slice %117 {offsets = [0, 2, 0], sizes = [8, 8, 4], strides = [1, 1, 1]} : vector<8x10x4xbf16> to vector<8x8x4xbf16>
    %121 = tpu.concatenate %118, %119, %120 in 2 : vector<8x8x4xbf16>, vector<8x8x4xbf16>, vector<8x8x4xbf16> -> vector<8x8x12xbf16>
    %122 = vector.shape_cast %121 : vector<8x8x12xbf16> to vector<64x12xbf16>
    %c0_67 = arith.constant 0 : index
    %c0_68 = arith.constant 0 : index
    %c0_69 = arith.constant 0 : index
    %c0_70 = arith.constant 0 : index
    %123 = vector.load %arg3[%c0_67, %c0_68, %c0_69, %c0_70] : memref<3x3x12x8xbf16, #tpu.memory_space<vmem>>, vector<1x1x12x8xbf16>
    %124 = vector.shape_cast %123 : vector<1x1x12x8xbf16> to vector<12x8xbf16>
    %cst_71 = arith.constant dense<0.000000e+00> : vector<64x8xf32>
    %125 = tpu.matmul %122, %124, %cst_71 {dimension_numbers = #tpu.dot_dimension_numbers<[1], [0], [0], [1], [0, 0, 1, 1], [], []>} : vector<64x12xbf16>, vector<12x8xbf16>, vector<64x8xf32> -> vector<64x8xf32>
    %126 = arith.addf %111, %125 : vector<64x8xf32>
    %127 = vector.extract_strided_slice %116 {offsets = [1, 0, 0], sizes = [8, 10, 4], strides = [1, 1, 1]} : vector<10x10x4xbf16> to vector<8x10x4xbf16>
    %128 = vector.extract_strided_slice %127 {offsets = [0, 0, 0], sizes = [8, 8, 4], strides = [1, 1, 1]} : vector<8x10x4xbf16> to vector<8x8x4xbf16>
    %129 = vector.extract_strided_slice %127 {offsets = [0, 1, 0], sizes = [8, 8, 4], strides = [1, 1, 1]} : vector<8x10x4xbf16> to vector<8x8x4xbf16>
    %130 = vector.extract_strided_slice %127 {offsets = [0, 2, 0], sizes = [8, 8, 4], strides = [1, 1, 1]} : vector<8x10x4xbf16> to vector<8x8x4xbf16>
    %131 = tpu.concatenate %128, %129, %130 in 2 : vector<8x8x4xbf16>, vector<8x8x4xbf16>, vector<8x8x4xbf16> -> vector<8x8x12xbf16>
    %132 = vector.shape_cast %131 : vector<8x8x12xbf16> to vector<64x12xbf16>
    %c0_72 = arith.constant 0 : index
    %c1_73 = arith.constant 1 : index
    %c0_74 = arith.constant 0 : index
    %c0_75 = arith.constant 0 : index
    %133 = vector.load %arg3[%c0_72, %c1_73, %c0_74, %c0_75] : memref<3x3x12x8xbf16, #tpu.memory_space<vmem>>, vector<1x1x12x8xbf16>
    %134 = vector.shape_cast %133 : vector<1x1x12x8xbf16> to vector<12x8xbf16>
    %cst_76 = arith.constant dense<0.000000e+00> : vector<64x8xf32>
    %135 = tpu.matmul %132, %134, %cst_76 {dimension_numbers = #tpu.dot_dimension_numbers<[1], [0], [0], [1], [0, 0, 1, 1], [], []>} : vector<64x12xbf16>, vector<12x8xbf16>, vector<64x8xf32> -> vector<64x8xf32>
    %136 = arith.addf %126, %135 : vector<64x8xf32>
    %137 = vector.extract_strided_slice %116 {offsets = [2, 0, 0], sizes = [8, 10, 4], strides = [1, 1, 1]} : vector<10x10x4xbf16> to vector<8x10x4xbf16>
    %138 = vector.extract_strided_slice %137 {offsets = [0, 0, 0], sizes = [8, 8, 4], strides = [1, 1, 1]} : vector<8x10x4xbf16> to vector<8x8x4xbf16>
    %139 = vector.extract_strided_slice %137 {offsets = [0, 1, 0], sizes = [8, 8, 4], strides = [1, 1, 1]} : vector<8x10x4xbf16> to vector<8x8x4xbf16>
    %140 = vector.extract_strided_slice %137 {offsets = [0, 2, 0], sizes = [8, 8, 4], strides = [1, 1, 1]} : vector<8x10x4xbf16> to vector<8x8x4xbf16>
    %141 = tpu.concatenate %138, %139, %140 in 2 : vector<8x8x4xbf16>, vector<8x8x4xbf16>, vector<8x8x4xbf16> -> vector<8x8x12xbf16>
    %142 = vector.shape_cast %141 : vector<8x8x12xbf16> to vector<64x12xbf16>
    %c0_77 = arith.constant 0 : index
    %c2_78 = arith.constant 2 : index
    %c0_79 = arith.constant 0 : index
    %c0_80 = arith.constant 0 : index
    %143 = vector.load %arg3[%c0_77, %c2_78, %c0_79, %c0_80] : memref<3x3x12x8xbf16, #tpu.memory_space<vmem>>, vector<1x1x12x8xbf16>
    %144 = vector.shape_cast %143 : vector<1x1x12x8xbf16> to vector<12x8xbf16>
    %cst_81 = arith.constant dense<0.000000e+00> : vector<64x8xf32>
    %145 = tpu.matmul %142, %144, %cst_81 {dimension_numbers = #tpu.dot_dimension_numbers<[1], [0], [0], [1], [0, 0, 1, 1], [], []>} : vector<64x12xbf16>, vector<12x8xbf16>, vector<64x8xf32> -> vector<64x8xf32>
    %146 = arith.addf %136, %145 : vector<64x8xf32>
    %c1_i32_82 = arith.constant 1 : i32
    %147 = arith.muli %110, %c1_i32_82 : i32
    %c1_i32_83 = arith.constant 1 : i32
    %148 = arith.addi %147, %c1_i32_83 : i32
    %c0_84 = arith.constant 0 : index
    %149 = arith.index_cast %148 : i32 to index
    %c0_85 = arith.constant 0 : index
    %c0_86 = arith.constant 0 : index
    %c0_87 = arith.constant 0 : index
    %150 = vector.load %arg2[%c0_84, %149, %c0_85, %c0_86, %c0_87] : memref<1x10x10x10x4xbf16, #tpu.memory_space<vmem>>, vector<1x1x10x10x4xbf16>
    %151 = vector.shape_cast %150 : vector<1x1x10x10x4xbf16> to vector<10x10x4xbf16>
    %152 = vector.extract_strided_slice %151 {offsets = [0, 0, 0], sizes = [8, 10, 4], strides = [1, 1, 1]} : vector<10x10x4xbf16> to vector<8x10x4xbf16>
    %153 = vector.extract_strided_slice %152 {offsets = [0, 0, 0], sizes = [8, 8, 4], strides = [1, 1, 1]} : vector<8x10x4xbf16> to vector<8x8x4xbf16>
    %154 = vector.extract_strided_slice %152 {offsets = [0, 1, 0], sizes = [8, 8, 4], strides = [1, 1, 1]} : vector<8x10x4xbf16> to vector<8x8x4xbf16>
    %155 = vector.extract_strided_slice %152 {offsets = [0, 2, 0], sizes = [8, 8, 4], strides = [1, 1, 1]} : vector<8x10x4xbf16> to vector<8x8x4xbf16>
    %156 = tpu.concatenate %153, %154, %155 in 2 : vector<8x8x4xbf16>, vector<8x8x4xbf16>, vector<8x8x4xbf16> -> vector<8x8x12xbf16>
    %157 = vector.shape_cast %156 : vector<8x8x12xbf16> to vector<64x12xbf16>
    %c1_88 = arith.constant 1 : index
    %c0_89 = arith.constant 0 : index
    %c0_90 = arith.constant 0 : index
    %c0_91 = arith.constant 0 : index
    %158 = vector.load %arg3[%c1_88, %c0_89, %c0_90, %c0_91] : memref<3x3x12x8xbf16, #tpu.memory_space<vmem>>, vector<1x1x12x8xbf16>
    %159 = vector.shape_cast %158 : vector<1x1x12x8xbf16> to vector<12x8xbf16>
    %cst_92 = arith.constant dense<0.000000e+00> : vector<64x8xf32>
    %160 = tpu.matmul %157, %159, %cst_92 {dimension_numbers = #tpu.dot_dimension_numbers<[1], [0], [0], [1], [0, 0, 1, 1], [], []>} : vector<64x12xbf16>, vector<12x8xbf16>, vector<64x8xf32> -> vector<64x8xf32>
    %161 = arith.addf %146, %160 : vector<64x8xf32>
    %162 = vector.extract_strided_slice %151 {offsets = [1, 0, 0], sizes = [8, 10, 4], strides = [1, 1, 1]} : vector<10x10x4xbf16> to vector<8x10x4xbf16>
    %163 = vector.extract_strided_slice %162 {offsets = [0, 0, 0], sizes = [8, 8, 4], strides = [1, 1, 1]} : vector<8x10x4xbf16> to vector<8x8x4xbf16>
    %164 = vector.extract_strided_slice %162 {offsets = [0, 1, 0], sizes = [8, 8, 4], strides = [1, 1, 1]} : vector<8x10x4xbf16> to vector<8x8x4xbf16>
    %165 = vector.extract_strided_slice %162 {offsets = [0, 2, 0], sizes = [8, 8, 4], strides = [1, 1, 1]} : vector<8x10x4xbf16> to vector<8x8x4xbf16>
    %166 = tpu.concatenate %163, %164, %165 in 2 : vector<8x8x4xbf16>, vector<8x8x4xbf16>, vector<8x8x4xbf16> -> vector<8x8x12xbf16>
    %167 = vector.shape_cast %166 : vector<8x8x12xbf16> to vector<64x12xbf16>
    %c1_93 = arith.constant 1 : index
    %c1_94 = arith.constant 1 : index
    %c0_95 = arith.constant 0 : index
    %c0_96 = arith.constant 0 : index
    %168 = vector.load %arg3[%c1_93, %c1_94, %c0_95, %c0_96] : memref<3x3x12x8xbf16, #tpu.memory_space<vmem>>, vector<1x1x12x8xbf16>
    %169 = vector.shape_cast %168 : vector<1x1x12x8xbf16> to vector<12x8xbf16>
    %cst_97 = arith.constant dense<0.000000e+00> : vector<64x8xf32>
    %170 = tpu.matmul %167, %169, %cst_97 {dimension_numbers = #tpu.dot_dimension_numbers<[1], [0], [0], [1], [0, 0, 1, 1], [], []>} : vector<64x12xbf16>, vector<12x8xbf16>, vector<64x8xf32> -> vector<64x8xf32>
    %171 = arith.addf %161, %170 : vector<64x8xf32>
    %172 = vector.extract_strided_slice %151 {offsets = [2, 0, 0], sizes = [8, 10, 4], strides = [1, 1, 1]} : vector<10x10x4xbf16> to vector<8x10x4xbf16>
    %173 = vector.extract_strided_slice %172 {offsets = [0, 0, 0], sizes = [8, 8, 4], strides = [1, 1, 1]} : vector<8x10x4xbf16> to vector<8x8x4xbf16>
    %174 = vector.extract_strided_slice %172 {offsets = [0, 1, 0], sizes = [8, 8, 4], strides = [1, 1, 1]} : vector<8x10x4xbf16> to vector<8x8x4xbf16>
    %175 = vector.extract_strided_slice %172 {offsets = [0, 2, 0], sizes = [8, 8, 4], strides = [1, 1, 1]} : vector<8x10x4xbf16> to vector<8x8x4xbf16>
    %176 = tpu.concatenate %173, %174, %175 in 2 : vector<8x8x4xbf16>, vector<8x8x4xbf16>, vector<8x8x4xbf16> -> vector<8x8x12xbf16>
    %177 = vector.shape_cast %176 : vector<8x8x12xbf16> to vector<64x12xbf16>
    %c1_98 = arith.constant 1 : index
    %c2_99 = arith.constant 2 : index
    %c0_100 = arith.constant 0 : index
    %c0_101 = arith.constant 0 : index
    %178 = vector.load %arg3[%c1_98, %c2_99, %c0_100, %c0_101] : memref<3x3x12x8xbf16, #tpu.memory_space<vmem>>, vector<1x1x12x8xbf16>
    %179 = vector.shape_cast %178 : vector<1x1x12x8xbf16> to vector<12x8xbf16>
    %cst_102 = arith.constant dense<0.000000e+00> : vector<64x8xf32>
    %180 = tpu.matmul %177, %179, %cst_102 {dimension_numbers = #tpu.dot_dimension_numbers<[1], [0], [0], [1], [0, 0, 1, 1], [], []>} : vector<64x12xbf16>, vector<12x8xbf16>, vector<64x8xf32> -> vector<64x8xf32>
    %181 = arith.addf %171, %180 : vector<64x8xf32>
    %c1_i32_103 = arith.constant 1 : i32
    %182 = arith.muli %110, %c1_i32_103 : i32
    %c2_i32_104 = arith.constant 2 : i32
    %183 = arith.addi %182, %c2_i32_104 : i32
    %c0_105 = arith.constant 0 : index
    %184 = arith.index_cast %183 : i32 to index
    %c0_106 = arith.constant 0 : index
    %c0_107 = arith.constant 0 : index
    %c0_108 = arith.constant 0 : index
    %185 = vector.load %arg2[%c0_105, %184, %c0_106, %c0_107, %c0_108] : memref<1x10x10x10x4xbf16, #tpu.memory_space<vmem>>, vector<1x1x10x10x4xbf16>
    %186 = vector.shape_cast %185 : vector<1x1x10x10x4xbf16> to vector<10x10x4xbf16>
    %187 = vector.extract_strided_slice %186 {offsets = [0, 0, 0], sizes = [8, 10, 4], strides = [1, 1, 1]} : vector<10x10x4xbf16> to vector<8x10x4xbf16>
    %188 = vector.extract_strided_slice %187 {offsets = [0, 0, 0], sizes = [8, 8, 4], strides = [1, 1, 1]} : vector<8x10x4xbf16> to vector<8x8x4xbf16>
    %189 = vector.extract_strided_slice %187 {offsets = [0, 1, 0], sizes = [8, 8, 4], strides = [1, 1, 1]} : vector<8x10x4xbf16> to vector<8x8x4xbf16>
    %190 = vector.extract_strided_slice %187 {offsets = [0, 2, 0], sizes = [8, 8, 4], strides = [1, 1, 1]} : vector<8x10x4xbf16> to vector<8x8x4xbf16>
    %191 = tpu.concatenate %188, %189, %190 in 2 : vector<8x8x4xbf16>, vector<8x8x4xbf16>, vector<8x8x4xbf16> -> vector<8x8x12xbf16>
    %192 = vector.shape_cast %191 : vector<8x8x12xbf16> to vector<64x12xbf16>
    %c2_109 = arith.constant 2 : index
    %c0_110 = arith.constant 0 : index
    %c0_111 = arith.constant 0 : index
    %c0_112 = arith.constant 0 : index
    %193 = vector.load %arg3[%c2_109, %c0_110, %c0_111, %c0_112] : memref<3x3x12x8xbf16, #tpu.memory_space<vmem>>, vector<1x1x12x8xbf16>
    %194 = vector.shape_cast %193 : vector<1x1x12x8xbf16> to vector<12x8xbf16>
    %cst_113 = arith.constant dense<0.000000e+00> : vector<64x8xf32>
    %195 = tpu.matmul %192, %194, %cst_113 {dimension_numbers = #tpu.dot_dimension_numbers<[1], [0], [0], [1], [0, 0, 1, 1], [], []>} : vector<64x12xbf16>, vector<12x8xbf16>, vector<64x8xf32> -> vector<64x8xf32>
    %196 = arith.addf %181, %195 : vector<64x8xf32>
    %197 = vector.extract_strided_slice %186 {offsets = [1, 0, 0], sizes = [8, 10, 4], strides = [1, 1, 1]} : vector<10x10x4xbf16> to vector<8x10x4xbf16>
    %198 = vector.extract_strided_slice %197 {offsets = [0, 0, 0], sizes = [8, 8, 4], strides = [1, 1, 1]} : vector<8x10x4xbf16> to vector<8x8x4xbf16>
    %199 = vector.extract_strided_slice %197 {offsets = [0, 1, 0], sizes = [8, 8, 4], strides = [1, 1, 1]} : vector<8x10x4xbf16> to vector<8x8x4xbf16>
    %200 = vector.extract_strided_slice %197 {offsets = [0, 2, 0], sizes = [8, 8, 4], strides = [1, 1, 1]} : vector<8x10x4xbf16> to vector<8x8x4xbf16>
    %201 = tpu.concatenate %198, %199, %200 in 2 : vector<8x8x4xbf16>, vector<8x8x4xbf16>, vector<8x8x4xbf16> -> vector<8x8x12xbf16>
    %202 = vector.shape_cast %201 : vector<8x8x12xbf16> to vector<64x12xbf16>
    %c2_114 = arith.constant 2 : index
    %c1_115 = arith.constant 1 : index
    %c0_116 = arith.constant 0 : index
    %c0_117 = arith.constant 0 : index
    %203 = vector.load %arg3[%c2_114, %c1_115, %c0_116, %c0_117] : memref<3x3x12x8xbf16, #tpu.memory_space<vmem>>, vector<1x1x12x8xbf16>
    %204 = vector.shape_cast %203 : vector<1x1x12x8xbf16> to vector<12x8xbf16>
    %cst_118 = arith.constant dense<0.000000e+00> : vector<64x8xf32>
    %205 = tpu.matmul %202, %204, %cst_118 {dimension_numbers = #tpu.dot_dimension_numbers<[1], [0], [0], [1], [0, 0, 1, 1], [], []>} : vector<64x12xbf16>, vector<12x8xbf16>, vector<64x8xf32> -> vector<64x8xf32>
    %206 = arith.addf %196, %205 : vector<64x8xf32>
    %207 = vector.extract_strided_slice %186 {offsets = [2, 0, 0], sizes = [8, 10, 4], strides = [1, 1, 1]} : vector<10x10x4xbf16> to vector<8x10x4xbf16>
    %208 = vector.extract_strided_slice %207 {offsets = [0, 0, 0], sizes = [8, 8, 4], strides = [1, 1, 1]} : vector<8x10x4xbf16> to vector<8x8x4xbf16>
    %209 = vector.extract_strided_slice %207 {offsets = [0, 1, 0], sizes = [8, 8, 4], strides = [1, 1, 1]} : vector<8x10x4xbf16> to vector<8x8x4xbf16>
    %210 = vector.extract_strided_slice %207 {offsets = [0, 2, 0], sizes = [8, 8, 4], strides = [1, 1, 1]} : vector<8x10x4xbf16> to vector<8x8x4xbf16>
    %211 = tpu.concatenate %208, %209, %210 in 2 : vector<8x8x4xbf16>, vector<8x8x4xbf16>, vector<8x8x4xbf16> -> vector<8x8x12xbf16>
    %212 = vector.shape_cast %211 : vector<8x8x12xbf16> to vector<64x12xbf16>
    %c2_119 = arith.constant 2 : index
    %c2_120 = arith.constant 2 : index
    %c0_121 = arith.constant 0 : index
    %c0_122 = arith.constant 0 : index
    %213 = vector.load %arg3[%c2_119, %c2_120, %c0_121, %c0_122] : memref<3x3x12x8xbf16, #tpu.memory_space<vmem>>, vector<1x1x12x8xbf16>
    %214 = vector.shape_cast %213 : vector<1x1x12x8xbf16> to vector<12x8xbf16>
    %cst_123 = arith.constant dense<0.000000e+00> : vector<64x8xf32>
    %215 = tpu.matmul %212, %214, %cst_123 {dimension_numbers = #tpu.dot_dimension_numbers<[1], [0], [0], [1], [0, 0, 1, 1], [], []>} : vector<64x12xbf16>, vector<12x8xbf16>, vector<64x8xf32> -> vector<64x8xf32>
    %216 = arith.addf %206, %215 : vector<64x8xf32>
    %217 = vector.shape_cast %216 : vector<64x8xf32> to vector<8x8x8xf32>
    %218 = vector.shape_cast %217 : vector<8x8x8xf32> to vector<4x2x4x2x8xf32>
    %cst_124 = arith.constant dense<0xFF800000> : vector<4x4x8xf32>
    %219 = vector.multi_reduction <maximumf>, %218, %cst_124 [1, 3] : vector<4x2x4x2x8xf32> to vector<4x4x8xf32>
    %220 = arith.maximumf %109, %219 : vector<4x4x8xf32>
    %c0_125 = arith.constant 0 : index
    %c0_126 = arith.constant 0 : index
    %221 = vector.load %arg4[%c0_125, %c0_126] : memref<1x8xf32, #tpu.memory_space<vmem>>, vector<1x8xf32>
    %222 = vector.shape_cast %221 : vector<1x8xf32> to vector<1x1x8xf32>
    %223 = vector.broadcast %222 : vector<1x1x8xf32> to vector<4x4x8xf32>
    %224 = arith.addf %220, %223 : vector<4x4x8xf32>
    %225 = vector.shape_cast %224 : vector<4x4x8xf32> to vector<1x1x4x32xf32>
    %c0_127 = arith.constant 0 : index
    %c0_128 = arith.constant 0 : index
    %c0_129 = arith.constant 0 : index
    %c0_130 = arith.constant 0 : index
    %226 = vector.load %arg5[%c0_127, %c0_128, %c0_129, %c0_130] : memref<1x1x4x32xf32, #tpu.memory_space<vmem>>, vector<1x1x4x32xf32>
    tpu.vector_store %arg5[%c0_127, %c0_128, %c0_129, %c0_130], %225 {strides = array<i32>} : memref<1x1x4x32xf32, #tpu.memory_space<vmem>>, vector<1x1x4x32xf32>,
    return
  }
  func.func @transform_0(%arg0: i32, %arg1: i32) -> (i32, i32, i32, i32, i32) {
    %c0_i32 = arith.constant 0 : i32
    %c0_i32_0 = arith.constant 0 : i32
    %c0_i32_1 = arith.constant 0 : i32
    %c0_i32_2 = arith.constant 0 : i32
    %c0_i32_3 = arith.constant 0 : i32
    return %arg0, %c0_i32, %c0_i32_0, %c0_i32_1, %c0_i32_2 : i32, i32, i32, i32, i32
  }
  func.func @transform_1(%arg0: i32, %arg1: i32) -> (i32, i32, i32, i32) {
    %c0_i32 = arith.constant 0 : i32
    %c0_i32_0 = arith.constant 0 : i32
    %c0_i32_1 = arith.constant 0 : i32
    %c0_i32_2 = arith.constant 0 : i32
    %c0_i32_3 = arith.constant 0 : i32
    return %c0_i32, %c0_i32_0, %c0_i32_1, %c0_i32_2 : i32, i32, i32, i32
  }
  func.func @transform_2(%arg0: i32, %arg1: i32) -> (i32, i32) {
    %c0_i32 = arith.constant 0 : i32
    %c0_i32_0 = arith.constant 0 : i32
    %c0_i32_1 = arith.constant 0 : i32
    return %c0_i32, %c0_i32_0 : i32, i32
  }
  func.func @transform_3(%arg0: i32, %arg1: i32) -> (i32, i32, i32, i32) {
    %c0_i32 = arith.constant 0 : i32
    %c0_i32_0 = arith.constant 0 : i32
    %c0_i32_1 = arith.constant 0 : i32
    return %arg0, %arg1, %c0_i32, %c0_i32_0 : i32, i32, i32, i32
  }
}

</mosaic_0001>

<bundles_post_ra>
// kernel: tpu_custom_call.1
= control target key start
LH: loop header
LB: loop body
LE: loop exit
PB: predicated region body
PF: predicated region fallthrough
CT: control target
= control target key end

     0   :  { %8 = vsyncpa [#allocation3], 0  ;;  %s5775_s0 = inlined_call_operand.vmem [shape: bf16[2,10,10,10,4], index: 0, kind: input, shape index: {}]   ;;  %s5776_s1 = inlined_call_operand.vmem [shape: bf16[3,3,12,8], index: 1, kind: input, shape index: {}]   ;;  %s5777_s2 = inlined_call_operand.vmem [shape: f32[1,8], index: 2, kind: input, shape index: {}]   ;;  %s5778_s3 = inlined_call_operand.hbm [shape: f32[2,4,4,32], index: 3, kind: output, shape index: {}]  }
   0x1   :  { %10 = vsyncpa [#allocation3 + $0x1], 0  ;;  %s4574_s12 = smov 0   ;;  %s4576_s13 = smov 0  }
   0x2   :  { %s4578_s14 = smov 0   ;;  %s4580_s15 = smov 0  }
   0x3   :  { %s4582_s16 = smov 0   ;;  %s4584_s17 = smov 0  }
   0x4   :  { %s4586_s18 = smov 0   ;;  %s4588_s19 = smov 0  }
   0x5 LB: > { %s3650_s20 = sadd.s32 4294967295, %s4544_s19   ;;  %s3651_s21 = sadd.s32 4294967294, %s4544_s19   ;;  %s4544_s19 = sphi %s4588_s19, %s16_s19   ;;  %s4540_s18 = sphi %s4586_s18, %s5796_s18   ;;  %s4536_s17 = sphi %s4584_s17, %s5795_s17   ;;  %s4532_s16 = sphi %s4582_s16, %s5794_s16   ;;  %s4528_s15 = sphi %s4580_s15, %s5793_s15   ;;  %s4524_s14 = sphi %s4578_s14, %s5792_s14   ;;  %s4520_s13 = sphi %s4576_s13, %s5791_s13   ;;  %s4516_s12 = sphi %s4574_s12, %s5790_s12  }
   0x6   : > { %s25_s22 = sadd.s32 1, %s4536_s17  ;;  %s28_s23 = sadd.s32 1, %s4540_s18 }
   0x7   : > { %p26_p0 = scmp.ge.s32.totalorder %s25_s22, 4  ;;  %p115_p1 = scmp.ne.s32.totalorder %s4524_s14, %s4520_s13 }
   0x8   : > { %p116_p2 = scmp.eq.s32.totalorder %s3650_s20, 7  ;;  %p121_p5 = scmp.ne.s32.totalorder %s4520_s13, %s4516_s12 }
   0x9   : > { %s5798_s22 = smov (%p26_p0, %s25_s22), 0  ;;  %s5800_s23 = smov (!%p26_p0, %s28_s23), %s4540_s18 }
   0xa   : > { %s101_s24 = ssub.s32 %s4536_s17, %s5798_s22  ;;  %p4625_p3 = por %p116_p2, %p115_p1 }
   0xb   : > { %p30_p4 = scmp.ge.s32.totalorder %s5800_s23, 2  ;;  %p122_p6 = scmp.eq.s32.totalorder %s3651_s21, 7 }
   0xc   : > { %p3654_p7 = scmp.ge.s32.totalorder %s4544_s19, 1  ;;  %p154_p9 = scmp.lt.s32.totalorder %s4544_s19, 9 }
   0xd   : > { %s5802_s23 = smov (%p30_p4, %s5800_s23), 0  ;;  %p4634_p8 = por %p122_p6, %p121_p5 }
   0xe   : > { %s100_s27 = ssub.s32 %s4540_s18, %s5802_s23  ;;  %s105_s28 = sadd.s32 1, %s4524_s14 }
   0xf   : > { %s102_s29 = sor.u32 %s101_s24, %s100_s27  ;;  %p155_p10 = pnand %p3654_p7, %p154_p9 }
  0x10   : > { %p103_p11 = scmp.eq.s32.totalorder %s102_s29, 0 }
  0x11   : > { %158 = sbr.rel (%p155_p10) target bundleno = 807 (0x327), region = 32 }
  0x12   : > { %s4643_s30 = scalar_select %p103_p11, %s4524_s14, %s105_s28  }
  0x18   : > { %p178_p12 = scmp.lt.s32.totalorder %s4532_s16, 1  ;;  %s3905_s5 = smul.u32 160, %s4528_s15  ;;  %vm451_vm0 = vcmask 1045504   ;;  %vm344_vm1 = vcmask 31744   ;;  %vm369_vm2 = vcmask 64512   ;;  %vm438_vm3 = vcmask 97280  }
  0x19   : > { %s4546_s11 = smov 8   ;;  %s4547_s20 = smov 4   ;;  %vm2003_vm4 = vcmask 58368   ;;  %vm3465_vm5 = vcmask 1041409   ;;  %vm3468_vm6 = vcmask 1042434   ;;  %vm3471_vm7 = vcmask 1043459  }
  0x1a   : > { %s179_s4 = scalar_select %p178_p12, %s4532_s16, 1  ;;  %vm3542_vm8 = vcmask 130048   ;;  %vm3544_vm9 = vcmask 195584   ;;  %vm3546_vm10 = vcmask 257024  }
  0x1b   : > { %s4552_s7 = smov 24   ;;  %s175_s8 = sand.u32 1, %s4520_s13  }
  0x1c   : > { %s4322_s6 = smul.u32 800, %s179_s4  ;;  %s4553_s4 = smov [#allocation2]  }
  0x1e   : > { %s182_s9 = scalar_lea.vmem %s5775_s0, %s4322_s6  ;;  %s4550_s6 = smov 16  }
  0x1f   : > { %s4651_s10 = scalar_lea.vmem %s182_s9, %s3905_s5  ;;  %s3655_s9 = sshll.u32 %s175_s8, 2 }
  0x20   : > { %v4654_v0 = vld [vmem:[%s4651_s10 + $0x10] sm:$0xf]  ;;  %v193_v1 = vld [vmem:[%s4651_s10 + $0x14] sm:$0x1]  ;;  %v4658_v2 = vld [vmem:[%s4651_s10 + $0x8] sm:$0xf] }
  0x21   : > { %v3662_v3 = vcombine.low %v4654_v0, %v193_v1  ;;  %v191_v4 = vld [vmem:[%s4651_s10 + $0xc] sm:$0x1]  ;;  %v4663_v5 = vld [vmem:[%s4651_s10 + $0x58] sm:$0xf]  ;;  %v3703_v6 = vld [vmem:[%s4651_s10 + $0x5c] sm:$0x1] }
  0x22   : > { %v3661_v7 = vcombine.low %v4658_v2, %v191_v4  ;;  %v4668_v8 = vcombine.low %v4663_v5, %v3703_v6  ;;  %v4671_v9 = vld [vmem:[%s4651_s10 + $0x60] sm:$0xf]  ;;  %v3705_v10 = vld [vmem:[%s4651_s10 + $0x64] sm:$0x1]  ;;  %v4684_v20 = vld [vmem:[%s4651_s10 + $0x18] sm:$0xf] }
  0x23   : > { %v322_v11 = vrot.slane %v3662_v3, 1  ;;  %v4675_v12 = vcombine.low %v4671_v9, %v3705_v10  ;;  %v265_v13 = vshll.u32 %v3662_v3, 16  ;;  %v4678_v14 = vld [vmem:[%s4651_s10 + $0x20] sm:$0xf]  ;;  %v197_v15 = vld [vmem:[%s4651_s10 + $0x24] sm:$0x1] }
  0x24   : > { %v321_v16 = vrot.slane %v3661_v7, 1  ;;  %v795_v17 = vshrl.u32 %v4668_v8, 16  ;;  %v797_v18 = vshll.u32 %v4668_v8, 16  ;;  %v263_v19 = vshrl.u32 %v3662_v3, 16  ;;  %v195_v25 = vld [vmem:[%s4651_s10 + $0x1c] sm:$0x1] }
  0x25   : > { %332 = vrot.lane.b32.xlu1 %v322_v11, %s4546_s11  ;;  %v256_v21 = vshrl.u32 %v3661_v7, 16  ;;  %v258_v22 = vshll.u32 %v3661_v7, 16  ;;  %v802_v23 = vshrl.u32 %v4675_v12, 16  ;;  %v804_v24 = vshll.u32 %v4675_v12, 16  ;;  %v4698_v30 = vld [vmem:[%s4651_s10 + $0x70] sm:$0xf] }
  0x26   : > { %330 = vrot.lane.b32.xlu0 %v321_v16, %s4546_s11  ;;  %v799_v26 = vrot.slane %v797_v18, 1  ;;  %v267_v27 = vrot.slane %v265_v13, 1  ;;  %v4692_v28 = vcombine.low %v4678_v14, %v197_v15  ;;  %v4695_v29 = vcombine.low %v4684_v20, %v195_v25  ;;  %v3709_v31 = vld [vmem:[%s4651_s10 + $0x74] sm:$0x1]  ;;  %v4705_v35 = vld [vmem:[%s4651_s10 + $0x68] sm:$0xf] }
  0x27   : > { %v260_v32 = vrot.slane %v258_v22, 1  ;;  %v806_v33 = vrot.slane %v804_v24, 1  ;;  %v4702_v34 = vcombine.low %v4698_v30, %v3709_v31  ;;  %v3707_v36 = vld [vmem:[%s4651_s10 + $0x6c] sm:$0x1]  ;;  %v4722_v58 = vld [vmem:[%s4651_s10 + $0x30] sm:$0xf] }
  0x28   : > { %v800_v37 = vor.u32 %v799_v26, %v795_v17  ;;  %v279_v38 = vshll.u32 %v4692_v28, 16  ;;  %v277_v40 = vshrl.u32 %v4692_v28, 16  ;;  %v272_v41 = vshll.u32 %v4695_v29, 16  ;;  %v201_v59 = vld [vmem:[%s4651_s10 + $0x34] sm:$0x1]  ;;  %s177_s24 = scalar_lea.vmem [#allocation2], %s3655_s9 }
  0x29   : > { %v261_v39 = vor.u32 %v260_v32, %v256_v21  ;;  %v807_v42 = vor.u32 %v806_v33, %v802_v23  ;;  %v818_v44 = vshll.u32 %v4702_v34, 16  ;;  %v3723_v45 = vcombine.low %v4705_v35, %v3707_v36  ;;  %v4726_v60 = vld [vmem:[%s4651_s10 + $0x28] sm:$0xf]  ;;  %v199_v61 = vld [vmem:[%s4651_s10 + $0x2c] sm:$0x1]  ;;  %s3564_s27 = sshll.u32 %s177_s24, 4  ;;  %s5724_s27 = int_to_ptr.vmem [resolvable:$true] %s3564_s27 }
  0x2a   : > { %845 = vrot.lane.b32.xlu1 %v800_v37, %s4547_s20  ;;  %v281_v43 = vrot.slane %v279_v38, 1  ;;  %v268_v46 = vor.u32 %v267_v27, %v263_v19  ;;  %v270_v47 = vshrl.u32 %v4695_v29, 16  ;;  %v274_v48 = vrot.slane %v272_v41, 1  ;;  %v4738_v4 = vld [vmem:[%s4651_s10 + $0x80] sm:$0xf]  ;;  %s4454_s5 = sshll.u32 %s4553_s4, 4  ;;  %s4455_s5 = int_to_ptr.vmem [resolvable:$false] %s4454_s5 }
  0x2b   : > { %306 = vrot.lane.b32.xlu0 %v261_v39, %s4547_s20  ;;  %v811_v49 = vshll.u32 %v3723_v45, 16  ;;  %v816_v51 = vshrl.u32 %v4702_v34, 16  ;;  %v820_v52 = vrot.slane %v818_v44, 1  ;;  %v809_v54 = vshrl.u32 %v3723_v45, 16  ;;  %v3713_v6 = vld [vmem:[%s4651_s10 + $0x84] sm:$0x1]  ;;  %p4457_p2 = scmp.lt.s32.totalorder %s5724_s27, %s4455_s5 }
  0x2c   : > { %v282_v50 = vor.u32 %v281_v43, %v277_v40  ;;  %v275_v53 = vor.u32 %v274_v48, %v270_v47  ;;  %v861_v62 = vrot.slane %v4675_v12, 1  ;;  %v4732_v63 = vcombine.low %v4722_v58, %v201_v59  ;;  %v4742_v7 = vld [vmem:[%s4651_s10 + $0x78] sm:$0xf]  ;;  %v3711_v10 = vld [vmem:[%s4651_s10 + $0x7c] sm:$0x1] }
  0x2d   : > { %v813_v55 = vrot.slane %v811_v49, 1  ;;  %v821_v56 = vor.u32 %v820_v52, %v816_v51  ;;  %v860_v1 = vrot.slane %v4668_v8, 1  ;;  %v3665_v3 = vcombine.low %v4726_v60, %v199_v61  ;;  %v4757_v17 = vld [vmem:[%s4651_s10 + $0x38] sm:$0xf]  ;;  %v203_v18 = vld [vmem:[%s4651_s10 + $0x3c] sm:$0x1] }
  0x2e   : > { %847 = vrot.lane.b32.xlu1 %v807_v42, %s4547_s20  ;;  %v324_v11 = vrot.slane %v4692_v28, 1  ;;  %v293_v12 = vshll.u32 %v4732_v63, 16  ;;  %v4749_v13 = vcombine.low %v4738_v4, %v3713_v6  ;;  %v323_v8 = vrot.slane %v4695_v29, 1  ;;  %v4770_v29 = vld [vmem:[%s4651_s10 + $0x40] sm:$0xf] }
  0x2f   : > { %308 = vrot.lane.b32.xlu0 %v268_v46, %s4547_s20  ;;  %v814_v57 = vor.u32 %v813_v55, %v809_v54  ;;  %v286_v15 = vshll.u32 %v3665_v3, 16  ;;  %v4754_v16 = vcombine.low %v4742_v7, %v3711_v10  ;;  %v863_v19 = vrot.slane %v4702_v34, 1  ;;  %v205_v31 = vld [vmem:[%s4651_s10 + $0x44] sm:$0x1]  ;;  %v4782_v41 = vld [vmem:[%s4651_s10 + $0x88] sm:$0xf] }
  0x30   : > { %v862_v21 = vrot.slane %v3723_v45, 1  ;;  %v291_v22 = vshrl.u32 %v4732_v63, 16  ;;  %v295_v23 = vrot.slane %v293_v12, 1  ;;  %v284_v24 = vshrl.u32 %v3665_v3, 16  ;;  %v3715_v42 = vld [vmem:[%s4651_s10 + $0x8c] sm:$0x1] }
  0x31   : > { %v832_v25 = vshll.u32 %v4749_v13, 16  ;;  %v288_v26 = vrot.slane %v286_v15, 1  ;;  %v825_v27 = vshll.u32 %v4754_v16, 16  ;;  %v4767_v28 = vcombine.low %v4757_v17, %v203_v18  ;;  %v4793_v49 = vld [vmem:[%s4651_s10 + $0x90] sm:$0xf] }
  0x32   : > { %312 = vrot.lane.b32.xlu1 %v282_v50, %s4547_s20  ;;  %v296_v32 = vor.u32 %v295_v23, %v291_v22  ;;  %v830_v33 = vshrl.u32 %v4749_v13, 16  ;;  %v4776_v36 = vcombine.low %v4770_v29, %v205_v31  ;;  %v823_v38 = vshrl.u32 %v4754_v16, 16  ;;  %v3717_v50 = vld [vmem:[%s4651_s10 + $0x94] sm:$0x1]  ;;  %v4809_v12 = vld [vmem:[%s4651_s10 + $0x50] sm:$0xf] }
  0x33   : > { %310 = vrot.lane.b32.xlu0 %v275_v53, %s4547_s20  ;;  %v834_v34 = vrot.slane %v832_v25, 1  ;;  %v289_v37 = vor.u32 %v288_v26, %v284_v24  ;;  %v827_v39 = vrot.slane %v825_v27, 1  ;;  %v300_v40 = vshll.u32 %v4767_v28, 16  ;;  %v4437_v15 = vld [vmem:[%s5776_s1 + $0x8] sm:$0x3f]  }
  0x34   : > { %v396_v44 = vshll.u32 %v4776_v36, 16  ;;  %v298_v46 = vshrl.u32 %v4767_v28, 16  ;;  %v4790_v48 = vcombine.low %v4782_v41, %v3715_v42  ;;  %v325_v51 = vrot.slane %v3665_v3, 1  ;;  %v189_v18 = vld [vmem:[%s4651_s10 + $0x4] sm:$0x1]  ;;  %4304 = vmatprep.subr.msk.bf16.mxu0 %vm451_vm0, %v4437_v15  ;;  %4313 = vmatprep.subr.msk.bf16.mxu1 %vm451_vm0, %v4437_v15 }
  0x35   : > { %v835_v43 = vor.u32 %v834_v34, %v830_v33  ;;  %v828_v45 = vor.u32 %v827_v39, %v823_v38  ;;  %v302_v47 = vrot.slane %v300_v40, 1  ;;  %v394_v52 = vshrl.u32 %v4776_v36, 16  ;;  %v4839_v31 = vld [vmem:[%s4651_s10 + $0x98] sm:$0xf]  ;;  %v4845_v33 = vld [vmem:[%s4651_s10 + $0x48] sm:$0xf] }
  0x36   : > { %851 = vrot.lane.b32.xlu1 %v821_v56, %s4547_s20  ;;  %v398_v53 = vrot.slane %v396_v44, 1  ;;  %v3739_v54 = vcombine.low %v4793_v49, %v3717_v50  ;;  %v839_v56 = vshll.u32 %v4790_v48, 16  ;;  %v326_v61 = vrot.slane %v4732_v63, 1  ;;  %v4816_v63 = vld [vmem:[%s4651_s10] sm:$0xf] }
  0x37   : > { %849 = vrot.lane.b32.xlu0 %v814_v57, %s4547_s20  ;;  %v303_v55 = vor.u32 %v302_v47, %v298_v46  ;;  %v864_v3 = vrot.slane %v4754_v16, 1  ;;  %v865_v22 = vrot.slane %v4749_v13, 1  ;;  %v3660_v23 = vcombine.low %v4816_v63, %v189_v18  ;;  %v207_v34 = vld [vmem:[%s4651_s10 + $0x4c] sm:$0x1]  ;;  %v4856_v50 = vld [vmem:[%s4651_s10 + $0xa8] sm:$0xf] }
  0x38   : > { %v399_v57 = vor.u32 %v398_v53, %v394_v52  ;;  %v1047_v59 = vshll.u32 %v3739_v54, 16  ;;  %v1045_v6 = vshrl.u32 %v3739_v54, 16  ;;  %v453_v24 = vsel %vm451_vm0, %v4437_v15, 0  ;;  %v3763_v52 = vld [vmem:[%s4651_s10 + $0xa4] sm:$0x1] }
  0x39   : > { %3997 = vmatpush3.bf16.msra.mxu0 %v453_v24  ;;  %4087 = vmatpush3.bf16.msra.mxu1 %v453_v24  ;;  %v402_v25 = vrot.slane %v4776_v36, 1  ;;  %v327_v13 = vrot.slane %v4767_v28, 1  ;;  %v251_v27 = vshll.u32 %v3660_v23, 16  ;;  %v1053_v36 = vrot.slane %v3739_v54, 1 }
  0x3a   : > { %871 = vrot.lane.b32.xlu1 %v861_v62, %s4546_s11  ;;  %v837_v62 = vshrl.u32 %v4790_v48, 16  ;;  %v1049_v10 = vrot.slane %v1047_v59, 1  ;;  %v866_v39 = vrot.slane %v4790_v48, 1  ;;  %v249_v40 = vshrl.u32 %v3660_v23, 16  ;;  %v4860_v48 = vld [vmem:[%s4651_s10 + $0xa0] sm:$0xf] }
  0x3b   : > { %869 = vrot.lane.b32.xlu0 %v860_v1, %s4546_s11  ;;  %v841_v1 = vrot.slane %v839_v56, 1  ;;  %v253_v42 = vrot.slane %v251_v27, 1  ;;  %v320_v54 = vrot.slane %v3660_v23, 1 }
  0x3d   : > { %v254_v46 = vor.u32 %v253_v42, %v249_v40  ;;  %v4884_v40 = vld [vmem:[%s4651_s10 + $0xc8] sm:$0xf]  ;;  %v3773_v42 = vld [vmem:[%s4651_s10 + $0xcc] sm:$0x1] }
  0x3e   : > { %336 = vrot.lane.b32.xlu1 %v324_v11, %s4546_s11  ;;  %v842_v11 = vor.u32 %v841_v1, %v837_v62  ;;  %v3782_v62 = vcombine.low %v4860_v48, %v3763_v52  ;;  %v4868_v1 = vld [vmem:[%s4651_s10 + $0xb8] sm:$0xf] }
  0x3f   : > { %334 = vrot.lane.b32.xlu0 %v323_v8, %s4546_s11  ;;  %v3701_v8 = vld [vmem:[%s4651_s10 + $0x54] sm:$0x1]  ;;  %v4896_v52 = vld [vmem:[%s4651_s10 + $0xd8] sm:$0xf] }
  0x40   : > { %v3720_v16 = vcombine.low %v4809_v12, %v3701_v8 }
  0x42   : > { %875 = vrot.lane.b32.xlu1 %v863_v19, %s4546_s11  ;;  %v1050_v19 = vor.u32 %v1049_v10, %v1045_v6  ;;  %v790_v26 = vshll.u32 %v3720_v16, 16  ;;  %v859_v53 = vrot.slane %v3720_v16, 1  ;;  %v4872_v6 = vld [vmem:[%s4651_s10 + $0xb0] sm:$0xf]  ;;  %v3767_v10 = vld [vmem:[%s4651_s10 + $0xb4] sm:$0x1] }
  0x43   : > { %873 = vrot.lane.b32.xlu0 %v862_v21, %s4546_s11  ;;  %v4824_v21 = vld [vmem:[%s5776_s1] sm:$0x3f]  }
  0x44   : > { %4305 = vmatprep.subr.msk.bf16.mxu0 %vm451_vm0, %v4824_v21  ;;  %4314 = vmatprep.subr.msk.bf16.mxu1 %vm451_vm0, %v4824_v21  ;;  %v792_v38 = vrot.slane %v790_v26, 1 }
  0x46   : > { %316 = vrot.lane.b32.xlu1 %v296_v32, %s4547_s20  ;;  %v3719_v32 = vld [vmem:[%s4651_s10 + $0x9c] sm:$0x1] }
  0x47   : > { %314 = vrot.lane.b32.xlu0 %v289_v37, %s4547_s20  ;;  %v788_v37 = vshrl.u32 %v3720_v16, 16  ;;  %v3751_v28 = vcombine.low %v4839_v31, %v3719_v32  ;;  %v3784_v16 = vcombine.low %v4872_v6, %v3767_v10 }
  0x49   : > { %v793_v44 = vor.u32 %v792_v38, %v788_v37  ;;  %v1356_v32 = vshll.u32 %v3784_v16, 16 }
  0x4a   : > { %855 = vrot.lane.b32.xlu1 %v835_v43, %s4547_s20  ;;  %v3689_v43 = vcombine.low %v4845_v33, %v207_v34 }
  0x4b   : > { %853 = vrot.lane.b32.xlu0 %v828_v45, %s4547_s20  ;;  %v1171_v45 = vshll.u32 %v3751_v28, 16 }
  0x4c   : > { %v619_v47 = vshll.u32 %v3689_v43, 16  ;;  %v617_v59 = vshrl.u32 %v3689_v43, 16  ;;  %v625_v26 = vrot.slane %v3689_v43, 1  ;;  %v4888_v43 = vld [vmem:[%s4651_s10 + $0xc0] sm:$0xf] }
  0x4d   : > { %v1173_v56 = vrot.slane %v1171_v45, 1 }
  0x4e   : > { %338 = vrot.lane.b32.xlu1 %v325_v51, %s4546_s11  ;;  %v3765_v51 = vld [vmem:[%s4651_s10 + $0xac] sm:$0x1] }
  0x4f   : > { %318 = vrot.lane.b32.xlu0 %v303_v55, %s4547_s20  ;;  %v1169_v55 = vshrl.u32 %v3751_v28, 16 }
  0x52   : > { %400 = vrot.lane.b32.xlu1 %v399_v57, %s4547_s20  ;;  %v3783_v57 = vcombine.low %v4856_v50, %v3765_v51 }
  0x53   : > { %340 = vrot.lane.b32.xlu0 %v326_v61, %s4546_s11  ;;  %v621_v61 = vrot.slane %v619_v47, 1 }
  0x54   : > { %v1349_v8 = vshll.u32 %v3783_v57, 16  ;;  %v1347_v23 = vshrl.u32 %v3783_v57, 16 }
  0x55   : > { %v622_v18 = vor.u32 %v621_v61, %v617_v59 }
  0x56   : > { %877 = vrot.lane.b32.xlu1 %v864_v3, %s4546_s11  ;;  %v3769_v3 = vld [vmem:[%s4651_s10 + $0xbc] sm:$0x1]  ;;  %v1351_v24 = vrot.slane %v1349_v8, 1 }
  0x57   : > { %857 = vrot.lane.b32.xlu0 %v842_v11, %s4547_s20  ;;  %v1174_v11 = vor.u32 %v1173_v56, %v1169_v55  ;;  %v3785_v15 = vcombine.low %v4868_v1, %v3769_v3  ;;  %v3775_v55 = vld [vmem:[%s4651_s10 + $0xd4] sm:$0x1]  ;;  %v1412_v56 = vrot.slane %v3783_v57, 1  ;;  %v1411_v3 = vrot.slane %v3782_v62, 1 }
  0x58   : > { %v1352_v34 = vor.u32 %v1351_v24, %v1347_v23  ;;  %v1413_v57 = vrot.slane %v3784_v16, 1 }
  0x59   : > { %v1414_v8 = vrot.slane %v3785_v15, 1 }
  0x5a   : > { %1051 = vrot.lane.b32.xlu1 %v1050_v19, %s4547_s20  ;;  %v1342_v19 = vshll.u32 %v3782_v62, 16 }
  0x5b   : > { %879 = vrot.lane.b32.xlu0 %v865_v22, %s4546_s11  ;;  %v1177_v22 = vrot.slane %v3751_v28, 1  ;;  %v1354_v28 = vshrl.u32 %v3784_v16, 16  ;;  %v3779_v16 = vld [vmem:[%s4651_s10 + $0xe4] sm:$0x1] }
  0x5c   : > { %v1344_v27 = vrot.slane %v1342_v19, 1 }
  0x5e   : > { %403 = vrot.lane.b32.xlu1 %v402_v25, %s4546_s11  ;;  %v1363_v25 = vshll.u32 %v3785_v15, 16 }
  0x5f   : > { %342 = vrot.lane.b32.xlu0 %v327_v13, %s4546_s11  ;;  %v1340_v13 = vshrl.u32 %v3782_v62, 16 }
  0x60   : > { %v1365_v37 = vrot.slane %v1363_v25, 1 }
  0x61   : > { %v1345_v38 = vor.u32 %v1344_v27, %v1340_v13 }
  0x62   : > { %1054 = vrot.lane.b32.xlu1 %v1053_v36, %s4546_s11  ;;  %v1361_v36 = vshrl.u32 %v3785_v15, 16 }
  0x63   : > { %881 = vrot.lane.b32.xlu0 %v866_v39, %s4546_s11  ;;  %v1358_v39 = vrot.slane %v1356_v32, 1 }
  0x64   : > { %v1366_v45 = vor.u32 %v1365_v37, %v1361_v36 }
  0x65   : > { %v1359_v47 = vor.u32 %v1358_v39, %v1354_v28  ;;  %v4919_v28 = vld [vmem:[%s4651_s10 + $0xe8] sm:$0xf]  ;;  %v3781_v39 = vld [vmem:[%s4651_s10 + $0xec] sm:$0x1] }
  0x66   : > { %843 = vrot.lane.b32.xlu1 %v793_v44, %s4547_s20  ;;  %v3771_v44 = vld [vmem:[%s4651_s10 + $0xc4] sm:$0x1] }
  0x67   : > { %304 = vrot.lane.b32.xlu0 %v254_v46, %s4547_s20  ;;  %v3787_v46 = vcombine.low %v4884_v40, %v3773_v42  ;;  %v3786_v51 = vcombine.low %v4888_v43, %v3771_v44 }
  0x69   : > { %v1377_v59 = vshll.u32 %v3787_v46, 16  ;;  %v1370_v10 = vshll.u32 %v3786_v51, 16  ;;  %v1368_v23 = vshrl.u32 %v3786_v51, 16  ;;  %v1416_v42 = vrot.slane %v3787_v46, 1 }
  0x6a   : > { %867 = vrot.lane.b32.xlu1 %v859_v53, %s4546_s11  ;;  %v3777_v53 = vld [vmem:[%s4651_s10 + $0xdc] sm:$0x1]  ;;  %v1415_v44 = vrot.slane %v3786_v51, 1  ;;  %v4938_v51 = vld [vmem:[%s4651_s10 + $0x108] sm:$0xf] }
  0x6b   : > { %328 = vrot.lane.b32.xlu0 %v320_v54, %s4546_s11  ;;  %v4900_v54 = vld [vmem:[%s4651_s10 + $0xd0] sm:$0xf]  ;;  %v3789_v61 = vcombine.low %v4896_v52, %v3777_v53  ;;  %v1379_v19 = vrot.slane %v1377_v59, 1  ;;  %v1372_v24 = vrot.slane %v1370_v10, 1  ;;  %v4926_v53 = vld [vmem:[%s4651_s10 + $0xf8] sm:$0xf] }
  0x6c   : > { %v3849_v59 = vld [vmem:[%s4651_s10 + $0xf4] sm:$0x1] }
  0x6d   : > { %v1373_v15 = vor.u32 %v1372_v24, %v1368_v23  ;;  %v4946_v23 = vld [vmem:[%s4651_s10 + $0x100] sm:$0xf]  ;;  %v3853_v24 = vld [vmem:[%s4651_s10 + $0x104] sm:$0x1] }
  0x6e   : > { %1175 = vrot.lane.b32.xlu1 %v1174_v11, %s4547_s20  ;;  %v3788_v11 = vcombine.low %v4900_v54, %v3775_v55  ;;  %v3851_v55 = vld [vmem:[%s4651_s10 + $0xfc] sm:$0x1] }
  0x6f   : > { %623 = vrot.lane.b32.xlu0 %v622_v18, %s4547_s20  ;;  %v1375_v18 = vshrl.u32 %v3787_v46, 16  ;;  %v4935_v46 = vcombine.low %v4926_v53, %v3851_v55 }
  0x70   : > { %v1384_v25 = vshll.u32 %v3788_v11, 16  ;;  %v1382_v27 = vshrl.u32 %v3788_v11, 16  ;;  %v1417_v10 = vrot.slane %v3788_v11, 1 }
  0x71   : > { %v1380_v62 = vor.u32 %v1379_v19, %v1375_v18 }
  0x72   : > { %1178 = vrot.lane.b32.xlu1 %v1177_v22, %s4546_s11  ;;  %v1391_v22 = vshll.u32 %v3789_v61, 16  ;;  %v1386_v32 = vrot.slane %v1384_v25, 1  ;;  %v2644_v25 = vshll.u32 %v4935_v46, 16 }
  0x73   : > { %626 = vrot.lane.b32.xlu0 %v625_v26, %s4546_s11  ;;  %v1389_v26 = vshrl.u32 %v3789_v61, 16 }
  0x74   : > { %v1393_v13 = vrot.slane %v1391_v22, 1  ;;  %v1387_v37 = vor.u32 %v1386_v32, %v1382_v27  ;;  %v4957_v27 = vcombine.low %v4946_v23, %v3853_v24 }
  0x76   : > { %1397 = vrot.lane.b32.xlu1 %v1352_v34, %s4547_s20  ;;  %v4912_v34 = vld [vmem:[%s4651_s10 + $0xe0] sm:$0xf]  ;;  %v1394_v36 = vor.u32 %v1393_v13, %v1389_v26 }
  0x77   : > { %1395 = vrot.lane.b32.xlu0 %v1345_v38, %s4547_s20  ;;  %v3801_v38 = vcombine.low %v4912_v34, %v3779_v16  ;;  %v2642_v16 = vshrl.u32 %v4935_v46, 16 }
  0x7a   : > { %1401 = vrot.lane.b32.xlu1 %v1366_v45, %s4547_s20  ;;  %v1599_v45 = vshll.u32 %v3801_v38, 16 }
  0x7b   : > { %1399 = vrot.lane.b32.xlu0 %v1359_v47, %s4547_s20  ;;  %v3813_v47 = vcombine.low %v4919_v28, %v3781_v39 }
  0x7c   : > { %v1601_v18 = vrot.slane %v1599_v45, 1  ;;  %v2651_v45 = vshll.u32 %v4957_v27, 16 }
  0x7d   : > { %v1723_v19 = vshll.u32 %v3813_v47, 16  ;;  %v1721_v11 = vshrl.u32 %v3813_v47, 16  ;;  %v1729_v32 = vrot.slane %v3813_v47, 1 }
  0x7e   : > { %1421 = vrot.lane.b32.xlu1 %v1412_v56, %s4546_s11  ;;  %v4930_v56 = vld [vmem:[%s4651_s10 + $0xf0] sm:$0xf] }
  0x7f   : > { %1419 = vrot.lane.b32.xlu0 %v1411_v3, %s4546_s11  ;;  %v1418_v3 = vrot.slane %v3789_v61, 1  ;;  %v4942_v22 = vcombine.low %v4930_v56, %v3849_v59  ;;  %v1605_v61 = vrot.slane %v3801_v38, 1  ;;  %v1725_v13 = vrot.slane %v1723_v19, 1  ;;  %v4970_v19 = vld [vmem:[%s4651_s10 + $0x118] sm:$0xf] }
  0x81   : > { %v1726_v39 = vor.u32 %v1725_v13, %v1721_v11  ;;  %v3857_v11 = vld [vmem:[%s4651_s10 + $0x114] sm:$0x1] }
  0x82   : > { %1425 = vrot.lane.b32.xlu1 %v1414_v8, %s4546_s11  ;;  %v1597_v8 = vshrl.u32 %v3801_v38, 16 }
  0x83   : > { %1423 = vrot.lane.b32.xlu0 %v1413_v57, %s4546_s11  ;;  %v3855_v57 = vld [vmem:[%s4651_s10 + $0x10c] sm:$0x1] }
  0x84   : > { %v1602_v26 = vor.u32 %v1601_v18, %v1597_v8  ;;  %v2649_v8 = vshrl.u32 %v4957_v27, 16  ;;  %v2653_v18 = vrot.slane %v2651_v45, 1 }
  0x86   : > { %1405 = vrot.lane.b32.xlu1 %v1380_v62, %s4547_s20  ;;  %v4952_v62 = vcombine.low %v4938_v51, %v3855_v57  ;;  %v3859_v57 = vld [vmem:[%s4651_s10 + $0x11c] sm:$0x1] }
  0x87   : > { %1403 = vrot.lane.b32.xlu0 %v1373_v15, %s4547_s20  ;;  %v2637_v15 = vshll.u32 %v4942_v22, 16  ;;  %v4979_v13 = vcombine.low %v4970_v19, %v3859_v57 }
  0x88   : > { %v2656_v59 = vshrl.u32 %v4952_v62, 16 }
  0x8a   : > { %1409 = vrot.lane.b32.xlu1 %v1394_v36, %s4547_s20  ;;  %v2646_v36 = vrot.slane %v2644_v25, 1 }
  0x8b   : > { %1407 = vrot.lane.b32.xlu0 %v1387_v37, %s4547_s20  ;;  %v2658_v37 = vshll.u32 %v4952_v62, 16 }
  0x8c   : > { %v2647_v47 = vor.u32 %v2646_v36, %v2642_v16  ;;  %v4986_v16 = vld [vmem:[%s4651_s10 + $0x128] sm:$0xf]  ;;  %v3863_v36 = vld [vmem:[%s4651_s10 + $0x12c] sm:$0x1] }
  0x8d   : > { %5785 = vst [vmem:[#allocation6_spill] sm:$0xff] %v4986_v16 }
  0x8e   : > { %1429 = vrot.lane.b32.xlu1 %v1416_v42, %s4546_s11  ;;  %v2635_v42 = vshrl.u32 %v4942_v22, 16 }
  0x8f   : > { %1427 = vrot.lane.b32.xlu0 %v1415_v44, %s4546_s11  ;;  %v2639_v44 = vrot.slane %v2637_v15, 1  ;;  %v2654_v15 = vor.u32 %v2653_v18, %v2649_v8 }
  0x92   : > { %1433 = vrot.lane.b32.xlu1 %v1418_v3, %s4546_s11  ;;  %v2660_v3 = vrot.slane %v2658_v37, 1 }
  0x93   : > { %1431 = vrot.lane.b32.xlu0 %v1417_v10, %s4546_s11  ;;  %v2640_v10 = vor.u32 %v2639_v44, %v2635_v42  ;;  %v4992_v42 = vld [vmem:[%s4651_s10 + $0x120] sm:$0xf]  ;;  %v3861_v44 = vld [vmem:[%s4651_s10 + $0x124] sm:$0x1] }
  0x94   : > { %5786 = vst [vmem:[#allocation7_spill] sm:$0xff] %v4992_v42 }
  0x96   : > { %1606 = vrot.lane.b32.xlu1 %v1605_v61, %s4546_s11  ;;  %v4974_v61 = vld [vmem:[%s4651_s10 + $0x110] sm:$0xf] }
  0x97   : > { %1603 = vrot.lane.b32.xlu0 %v1602_v26, %s4547_s20  ;;  %v333_v38 = vpop.permute.xlu1 %332  ;;  %5784 = vst [vmem:[#allocation5_spill] sm:$0xff] %v4974_v61  ;;  %v2661_v26 = vor.u32 %v2660_v3, %v2656_v59  ;;  %v2707_v3 = vrot.slane %v4935_v46, 1 }
  0x98   : > { %v331_v55 = vpop.permute.xlu0 %330 }
  0x9a   : > { %1730 = vrot.lane.b32.xlu1 %v1729_v32, %s4546_s11  ;;  %v4983_v32 = vcombine.low %v4974_v61, %v3857_v11  ;;  %v3865_v61 = vld [vmem:[%s4651_s10 + $0x134] sm:$0x1] }
  0x9b   : > { %1727 = vrot.lane.b32.xlu0 %v1726_v39, %s4547_s20 }
  0x9c   : > { %v846_v24 = vpop.permute.xlu1 %845 }
  0x9d   : > { %v307_v25 = vpop.permute.xlu0 %306 }
  0x9e   : > { %2692 = vrot.lane.b32.xlu1 %v2647_v47, %s4547_s20  ;;  %v350_v37 = vsel %vm344_vm1, %v4658_v2, %v307_v25  ;;  %v2706_v47 = vrot.slane %v4942_v22, 1  ;;  %v5002_v2 = vcombine.low %v4986_v16, %v3863_v36  ;;  %v2665_v22 = vshll.u32 %v4983_v32, 16  ;;  %v5033_v16 = vld [vmem:[%s4651_s10 + $0x130] sm:$0xf] }
  0x9f   : > { %2690 = vrot.lane.b32.xlu0 %v2640_v10, %s4547_s20  ;;  %v2672_v10 = vshll.u32 %v4979_v13, 16  ;;  %v5006_v8 = vsel %vm369_vm2, %v350_v37, %v331_v55  ;;  %v2709_v55 = vrot.slane %v4952_v62, 1  ;;  %v2670_v25 = vshrl.u32 %v4979_v13, 16 }
  0xa0   : > { %v848_v39 = vpop.permute.xlu1 %847  ;;  %v2663_v36 = vshrl.u32 %v4983_v32, 16  ;;  %v2667_v37 = vrot.slane %v2665_v22, 1 }
  0xa1   : > { %v309_v45 = vpop.permute.xlu0 %308 }
  0xa2   : > { %v353_v59 = vsel %vm344_vm1, %v4654_v0, %v309_v45  ;;  %2696 = vrot.lane.b32.xlu1 %v2661_v26, %s4547_s20  ;;  %v5013_v0 = vcombine.low %v4992_v42, %v3861_v44  ;;  %v2686_v26 = vshll.u32 %v5002_v2, 16  ;;  %v891_v42 = vsel %vm344_vm1, %v4671_v9, %v848_v39 }
  0xa3   : > { %2694 = vrot.lane.b32.xlu0 %v2654_v15, %s4547_s20  ;;  %v5009_v18 = vsel %vm369_vm2, %v353_v59, %v333_v38  ;;  %v2674_v38 = vrot.slane %v2672_v10, 1  ;;  %v2708_v15 = vrot.slane %v4957_v27, 1 }
  0xa4   : > { %v313_v57 = vpop.permute.xlu1 %312  ;;  %v3671_v46 = vcombine.low %v5006_v8, %v5009_v18  ;;  %v2679_v44 = vshll.u32 %v5013_v0, 16  ;;  %v2688_v10 = vrot.slane %v2686_v26, 1  ;;  %v2677_v27 = vshrl.u32 %v5013_v0, 16 }
  0xa5   : > { %v311_v11 = vpop.permute.xlu0 %310  ;;  %v2675_v62 = vor.u32 %v2674_v38, %v2670_v25 }
  0xa6   : > { %3998 = vmatprep.mubr.msk.bf16.mxu0 %vm438_vm3, %v3671_v46  ;;  %2716 = vrot.lane.b32.xlu1 %v2707_v3, %s4546_s11  ;;  %v2684_v3 = vshrl.u32 %v5002_v2, 16  ;;  %v2681_v46 = vrot.slane %v2679_v44, 1  ;;  %v356_v44 = vsel %vm344_vm1, %v4684_v20, %v311_v11  ;;  %v544_v11 = vsel %vm451_vm0, %v4824_v21, 0 }
  0xa7   : > { %2714 = vrot.lane.b32.xlu0 %v2706_v47, %s4546_s11  ;;  %v2668_v47 = vor.u32 %v2667_v37, %v2663_v36  ;;  %v3884_v36 = vcombine.low %v5033_v16, %v3865_v61  ;;  %v3867_v37 = vld [vmem:[%s4651_s10 + $0x13c] sm:$0x1]  ;;  %v2711_v61 = vrot.slane %v4979_v13, 1 }
  0xa8   : > { %v852_v45 = vpop.permute.xlu1 %851  ;;  %v2682_v39 = vor.u32 %v2681_v46, %v2677_v27  ;;  %v5079_v27 = vld [vmem:[%s5776_s1 + $0x10] sm:$0x3f]  }
  0xa9   : > { %v850_v59 = vpop.permute.xlu0 %849  ;;  %v2883_v20 = vshll.u32 %v3884_v36, 16 }
  0xaa   : > { %2720 = vrot.lane.b32.xlu1 %v2709_v55, %s4546_s11  ;;  %v888_v55 = vsel %vm344_vm1, %v4663_v5, %v846_v24  ;;  %v359_v5 = vsel %vm344_vm1, %v4678_v14, %v313_v57  ;;  %v2710_v14 = vrot.slane %v4983_v32, 1  ;;  %v897_v32 = vsel %vm344_vm1, %v4698_v30, %v852_v45 }
  0xab   : > { %2718 = vrot.lane.b32.xlu0 %v2708_v15, %s4546_s11  ;;  %v2689_v15 = vor.u32 %v2688_v10, %v2684_v3  ;;  %v894_v46 = vsel %vm344_vm1, %v4705_v35, %v850_v59  ;;  %v2881_v35 = vshrl.u32 %v3884_v36, 16  ;;  %v2885_v45 = vrot.slane %v2883_v20, 1 }
  0xac   : > { %v872_v22 = vpop.permute.xlu1 %871 }
  0xad   : > { %v5039_v25 = vsel %vm369_vm2, %v891_v42, %v872_v22  ;;  %v870_v38 = vpop.permute.xlu0 %869  ;;  %v5054_v42 = vld [vmem:[%s4651_s10 + $0x138] sm:$0xf]  ;;  %s3901_s10 = sshll.u32 %s4532_s16, 2  ;;  %s4450_s16 = scalar_lea.vmem %s5724_s27, 64 }
  0xae   : > { %v5042_v26 = vsel %vm369_vm2, %v888_v55, %v870_v38  ;;  %2700 = vrot.lane.b32.xlu1 %v2675_v62, %s4547_s20  ;;  %v2712_v38 = vrot.slane %v5013_v0, 1  ;;  %p4451_p13 = scmp.ne.s32.totalorder %s5724_s27, %s4450_s16 }
  0xaf   : > { %2698 = vrot.lane.b32.xlu0 %v2668_v47, %s4547_s20  ;;  %v5048_v9 = vcombine.low %v5042_v26, %v5039_v25  ;;  %v3893_v47 = vcombine.low %v5054_v42, %v3867_v37 }
  0xb0   : > { %v337_v24 = vpop.permute.xlu1 %336  ;;  %p4452_p0 = pnand %p4451_p13, %p4625_p3 }
  0xb1   : > { %v5060_v62 = vsel %vm369_vm2, %v359_v5, %v337_v24  ;;  %4088 = vmatprep.mubr.msk.bf16.mxu1 %vm438_vm3, %v5048_v9  ;;  %v335_v3 = vpop.permute.xlu0 %334  ;;  %v2996_v59 = vshll.u32 %v3893_v47, 16  ;;  %v2886_v5 = vor.u32 %v2885_v45, %v2881_v35  ;;  %v2994_v24 = vshrl.u32 %v3893_v47, 16 }
  0xb2   : > { %v5065_v10 = vsel %vm369_vm2, %v356_v44, %v335_v3  ;;  %2704 = vrot.lane.b32.xlu1 %v2689_v15, %s4547_s20  ;;  %v2713_v15 = vrot.slane %v5002_v2, 1  ;;  %v2889_v2 = vrot.slane %v3884_v36, 1  ;;  %p4453_p1 = pneg %p4452_p0 }
  0xb3   : > { %v3672_v57 = vcombine.low %v5065_v10, %v5060_v62  ;;  %2702 = vrot.lane.b32.xlu0 %v2682_v39, %s4547_s20  ;;  %v2998_v37 = vrot.slane %v2996_v59, 1 }
  0xb4   : > { %v876_v13 = vpop.permute.xlu1 %875 }
  0xb5   : > { %v5086_v22 = vsel %vm369_vm2, %v897_v32, %v876_v13  ;;  %3999 = vmatmul.mubr.msk.bf16.vlgmr.msra.gmra.mrb[0].mxu0 %vm438_vm3, %v3672_v57  ;;  %v874_v21 = vpop.permute.xlu0 %873 }
  0xb6   : > { %v5090_v55 = vsel %vm369_vm2, %v894_v46, %v874_v21  ;;  %2724 = vrot.lane.b32.xlu1 %v2711_v61, %s4546_s11  ;;  %4007 = vmatpush3.bf16.msra.mxu0 %v544_v11  ;;  %v2999_v61 = vor.u32 %v2998_v37, %v2994_v24 }
  0xb7   : > { %v5097_v30 = vcombine.low %v5090_v55, %v5086_v22  ;;  %2722 = vrot.lane.b32.xlu0 %v2710_v14, %s4546_s11  ;;  %4306 = vmatprep.subr.msk.bf16.mxu0 %vm451_vm0, %v5079_v27  ;;  %v3002_v14 = vrot.slane %v3893_v47, 1 }
  0xb8   : > { %v317_v39 = vpop.permute.xlu1 %316 }
  0xb9   : > { %4089 = vmatmul.mubr.msk.bf16.vlgmr.msra.gmra.mrb[0].mxu1 %vm438_vm3, %v5097_v30  ;;  %v315_v0 = vpop.permute.xlu0 %314 }
  0xba   : > { %2728 = vrot.lane.b32.xlu1 %v2713_v15, %s4546_s11  ;;  %4097 = vmatpush3.bf16.msra.mxu1 %v544_v11  ;;  %v365_v11 = vsel %vm344_vm1, %v4722_v58, %v317_v39  ;;  %v362_v32 = vsel %vm344_vm1, %v4726_v60, %v315_v0 }
  0xbb   : > { %2726 = vrot.lane.b32.xlu0 %v2712_v38, %s4546_s11  ;;  %4315 = vmatprep.subr.msk.bf16.mxu1 %vm451_vm0, %v5079_v27 }
  0xbc   : > { %v856_v44 = vpop.permute.xlu1 %855 }
  0xbd   : > { %v854_v3 = vpop.permute.xlu0 %853  ;;  %v903_v45 = vsel %vm344_vm1, %v4738_v4, %v856_v44 }
  0xbe   : > { %2890 = vrot.lane.b32.xlu1 %v2889_v2, %s4546_s11  ;;  %v900_v58 = vsel %vm344_vm1, %v4742_v7, %v854_v3 }
  0xbf   : > { %2887 = vrot.lane.b32.xlu0 %v2886_v5, %s4547_s20 }
  0xc0   : > { %v339_v57 = vpop.permute.xlu1 %338 }
  0xc1   : > { %v319_v20 = vpop.permute.xlu0 %318  ;;  %v381_v46 = vsel %vm369_vm2, %v362_v32, %v339_v57 }
  0xc2   : > { %3003 = vrot.lane.b32.xlu1 %v3002_v14, %s4546_s11  ;;  %v368_v24 = vsel %vm344_vm1, %v4757_v17, %v319_v20 }
  0xc3   : > { %3000 = vrot.lane.b32.xlu0 %v2999_v61, %s4547_s20  ;;  %s3560_s20 = sadd.s32 %s4528_s15, %s3901_s10  ;;  %s3549_s15 = scalar_lea.sflag [#allocation3], %s175_s8 }
  0xc4   : > { %v401_v36 = vpop.permute.xlu1 %400  ;;  %s3902_s21 = sshll.u32 %s3560_s20, 6 }
  0xc5   : > { %v341_v13 = vpop.permute.xlu0 %340  ;;  %v407_v2 = vsel %vm344_vm1, %v4770_v29, %v401_v36  ;;  %s5722_s29 = scalar_lea.hbm %s5778_s3, %s3902_s21 }
  0xc6   : > { %v383_v47 = vsel %vm369_vm2, %v365_v11, %v341_v13 }
  0xc7   : > { %v3673_v21 = vcombine.low %v381_v46, %v383_v47 }
  0xc8   : > { %v878_v38 = vpop.permute.xlu1 %877 }
  0xc9   : > { %4002 = vmatprep.mubr.msk.bf16.mxu0 %vm438_vm3, %v3673_v21  ;;  %v858_v15 = vpop.permute.xlu0 %857  ;;  %v918_v60 = vsel %vm369_vm2, %v900_v58, %v878_v38 }
  0xca   : > { %v906_v29 = vsel %vm344_vm1, %v4782_v41, %v858_v15 }
  0xcc   : > { %v1052_v35 = vpop.permute.xlu1 %1051 }
  0xcd   : > { %v880_v59 = vpop.permute.xlu0 %879  ;;  %v1058_v3 = vsel %vm344_vm1, %v4793_v49, %v1052_v35  ;;  %v5163_v35 = vcombine.low %v5039_v25, %v5090_v55 }
  0xce   : > { %v920_v39 = vsel %vm369_vm2, %v903_v45, %v880_v59  ;;  %v3682_v59 = vcombine.low %v5060_v62, %v381_v46 }
  0xcf   : > { %v5125_v0 = vcombine.low %v918_v60, %v920_v39 }
  0xd0   : > { %v404_v5 = vpop.permute.xlu1 %403 }
  0xd1   : > { %v5132_v37 = vsel %vm369_vm2, %v407_v2, %v404_v5  ;;  %4092 = vmatprep.mubr.msk.bf16.mxu1 %vm438_vm3, %v5125_v0  ;;  %v343_v4 = vpop.permute.xlu0 %342 }
  0xd2   : > { %v385_v7 = vsel %vm369_vm2, %v368_v24, %v343_v4 }
  0xd3   : > { %v3674_v44 = vcombine.low %v385_v7, %v5132_v37 }
  0xd4   : > { %v1055_v14 = vpop.permute.xlu1 %1054 }
  0xd5   : > { %v5143_v17 = vsel %vm369_vm2, %v1058_v3, %v1055_v14  ;;  %4003 = vmatmul.mubr.msk.bf16.gmra.mrb[4].mxu0 %vm438_vm3, %v3674_v44  ;;  %v882_v61 = vpop.permute.xlu0 %881 }
  0xd6   : > { %v922_v57 = vsel %vm369_vm2, %v906_v29, %v882_v61 }
  0xd7   : > { %v5148_v20 = vcombine.low %v922_v57, %v5143_v17 }
  0xd8   : > { %v844_v36 = vpop.permute.xlu1 %843 }
  0xd9   : > { %4093 = vmatmul.mubr.msk.bf16.gmra.mrb[4].mxu1 %vm438_vm3, %v5148_v20  ;;  %v305_v49 = vpop.permute.xlu0 %304  ;;  %v885_v11 = vsel %vm344_vm1, %v4809_v12, %v844_v36  ;;  %v648_v12 = vsel %vm451_vm0, %v5079_v27, 0  ;;  %v3683_v27 = vcombine.low %v383_v47, %v385_v7  ;;  %v4445_v47 = vld [vmem:[%s5776_s1 + $0x20] sm:$0x3f]  }
  0xda   : > { %v347_v32 = vsel %vm344_vm1, %v4816_v63, %v305_v49  ;;  %v3681_v63 = vcombine.low %v5009_v18, %v5065_v10  ;;  %v5188_v10 = vcombine.low %v920_v39, %v922_v57 }
  0xdc   : > { %v868_v41 = vpop.permute.xlu1 %867 }
  0xdd   : > { %v908_v13 = vsel %vm369_vm2, %v885_v11, %v868_v41  ;;  %v329_v21 = vpop.permute.xlu0 %328 }
  0xde   : > { %v5158_v38 = vcombine.low %v908_v13, %v5042_v26  ;;  %v371_v15 = vsel %vm369_vm2, %v347_v32, %v329_v21  ;;  %v4444_v26 = vld [vmem:[%s5776_s1 + $0x18] sm:$0x3f]  }
  0xdf   : > { %v3680_v45 = vcombine.low %v371_v15, %v5006_v8  ;;  %v5180_v8 = vcombine.low %v5086_v22, %v918_v60  ;;  %v964_v2 = vsel %vm451_vm0, %v4444_v26, 0  ;;  %v1088_v15 = vsel %vm451_vm0, %v4445_v47, 0 }
  0xe0   : > { %v1176_v58 = vpop.permute.xlu1 %1175  ;;  %4098 = vmatprep.mubr.msk.bf16.mxu1 %vm438_vm3, %v5158_v38 }
  0xe1   : > { %4008 = vmatprep.mubr.msk.bf16.mxu0 %vm438_vm3, %v3680_v45  ;;  %v624_v25 = vpop.permute.xlu0 %623  ;;  %4099 = vmatmul.mubr.msk.bf16.vlgmr.msra.gmra.mrb[0].mxu1 %vm438_vm3, %v5163_v35  ;;  %v1182_v24 = vsel %vm344_vm1, %v4839_v31, %v1176_v58 }
  0xe2   : > { %4009 = vmatmul.mubr.msk.bf16.vlgmr.msra.gmra.mrb[0].mxu0 %vm438_vm3, %v3681_v63  ;;  %4107 = vmatpush3.bf16.msra.mxu1 %v648_v12  ;;  %v630_v4 = vsel %vm344_vm1, %v4845_v33, %v624_v25 }
  0xe3   : > { %4017 = vmatpush3.bf16.msra.mxu0 %v648_v12  ;;  %4012 = vmatprep.mubr.msk.bf16.mxu0 %vm438_vm3, %v3682_v59 }
  0xe4   : > { %4102 = vmatprep.mubr.msk.bf16.mxu1 %vm438_vm3, %v5180_v8  ;;  %v1179_v18 = vpop.permute.xlu1 %1178  ;;  %4307 = vmatprep.subr.msk.bf16.mxu0 %vm451_vm0, %v4444_v26 }
  0xe5   : > { %v627_v62 = vpop.permute.xlu0 %626  ;;  %4316 = vmatprep.subr.msk.bf16.mxu1 %vm451_vm0, %v4444_v26  ;;  %v1184_v7 = vsel %vm369_vm2, %v1182_v24, %v1179_v18 }
  0xe6   : > { %v632_v31 = vsel %vm369_vm2, %v630_v4, %v627_v62 }
  0xe8   : > { %v1398_v22 = vpop.permute.xlu1 %1397 }
  0xe9   : > { %v1396_v55 = vpop.permute.xlu0 %1395  ;;  %4103 = vmatmul.mubr.msk.bf16.gmra.mrb[4].mxu1 %vm438_vm3, %v5188_v10  ;;  %v1440_v44 = vsel %vm344_vm1, %v4856_v50, %v1398_v22  ;;  %v5221_v50 = vcombine.low %v5143_v17, %v1184_v7 }
  0xea   : > { %4013 = vmatmul.mubr.msk.bf16.gmra.mrb[4].mxu0 %vm438_vm3, %v3683_v27  ;;  %4108 = vmatprep.mubr.msk.bf16.mxu1 %vm438_vm3, %v5163_v35  ;;  %v1437_v3 = vsel %vm344_vm1, %v4860_v48, %v1396_v55  ;;  %v3692_v48 = vcombine.low %v5132_v37, %v632_v31 }
  0xeb   : > { %4018 = vmatprep.mubr.msk.bf16.mxu0 %vm438_vm3, %v3681_v63 }
  0xec   : > { %v1402_v46 = vpop.permute.xlu1 %1401 }
  0xed   : > { %v1400_v60 = vpop.permute.xlu0 %1399  ;;  %v1446_v11 = vsel %vm344_vm1, %v4868_v1, %v1402_v46 }
  0xee   : > { %v1443_v17 = vsel %vm344_vm1, %v4872_v6, %v1400_v60  ;;  %v4446_v6 = vld [vmem:[%s5776_s1 + $0x28] sm:$0x3f]  }
  0xf0   : > { %v1422_v5 = vpop.permute.xlu1 %1421 }
  0xf1   : > { %v1420_v39 = vpop.permute.xlu0 %1419  ;;  %4109 = vmatmul.mubr.msk.bf16.vlgmr.msra.gmra.mrb[0].mxu1 %vm438_vm3, %v5180_v8  ;;  %v1462_v33 = vsel %vm369_vm2, %v1440_v44, %v1422_v5 }
  0xf2   : > { %4019 = vmatmul.mubr.msk.bf16.vlgmr.msra.gmra.mrb[0].mxu0 %vm438_vm3, %v3682_v59  ;;  %4117 = vmatpush3.bf16.msra.mxu1 %v964_v2  ;;  %v1460_v29 = vsel %vm369_vm2, %v1437_v3, %v1420_v39 }
  0xf3   : > { %4027 = vmatpush3.bf16.msra.mxu0 %v964_v2  ;;  %4022 = vmatprep.mubr.msk.bf16.mxu0 %vm438_vm3, %v3683_v27  ;;  %v5224_v57 = vcombine.low %v1460_v29, %v1462_v33  ;;  %v1200_v2 = vsel %vm451_vm0, %v4446_v6, 0  ;;  %v4448_v29 = vld [vmem:[%s5776_s1 + $0x38] sm:$0x3f]  }
  0xf4   : > { %4112 = vmatprep.mubr.msk.bf16.mxu1 %vm438_vm3, %v5188_v10  ;;  %v1426_v14 = vpop.permute.xlu1 %1425  ;;  %4308 = vmatprep.subr.msk.bf16.mxu0 %vm451_vm0, %v4445_v47 }
  0xf5   : > { %v1424_v61 = vpop.permute.xlu0 %1423  ;;  %4317 = vmatprep.subr.msk.bf16.mxu1 %vm451_vm0, %v4445_v47  ;;  %v1466_v37 = vsel %vm369_vm2, %v1446_v11, %v1426_v14  ;;  %v4447_v47 = vld [vmem:[%s5776_s1 + $0x30] sm:$0x3f]  }
  0xf6   : > { %v1464_v41 = vsel %vm369_vm2, %v1443_v17, %v1424_v61  ;;  %v1516_v31 = vsel %vm451_vm0, %v4447_v47, 0 }
  0xf7   : > { %v5239_v21 = vcombine.low %v1464_v41, %v1466_v37  ;;  %v5271_v22 = vcombine.low %v1462_v33, %v1464_v41 }
  0xf8   : > { %v1406_v36 = vpop.permute.xlu1 %1405 }
  0xf9   : > { %v1404_v49 = vpop.permute.xlu0 %1403  ;;  %4113 = vmatmul.mubr.msk.bf16.gmra.mrb[4].mxu1 %vm438_vm3, %v5221_v50  ;;  %v1452_v45 = vsel %vm344_vm1, %v4884_v40, %v1406_v36 }
  0xfa   : > { %4023 = vmatmul.mubr.msk.bf16.gmra.mrb[4].mxu0 %vm438_vm3, %v3692_v48  ;;  %4118 = vmatprep.mubr.msk.bf16.mxu1 %vm438_vm3, %v5224_v57 }
  0xfb   : > { %4028 = vmatprep.mubr.msk.bf16.mxu0 %vm438_vm3, %v5158_v38  ;;  %v1449_v38 = vsel %vm344_vm1, %v4888_v43, %v1404_v49 }
  0xfc   : > { %v1410_v32 = vpop.permute.xlu1 %1409 }
  0xfd   : > { %v1408_v13 = vpop.permute.xlu0 %1407  ;;  %v1458_v43 = vsel %vm344_vm1, %v4896_v52, %v1410_v32 }
  0xfe   : > { %v1455_v59 = vsel %vm344_vm1, %v4900_v54, %v1408_v13 }
 0x100   : > { %v1430_v1 = vpop.permute.xlu1 %1429 }
 0x101   : > { %v1470_v12 = vsel %vm369_vm2, %v1452_v45, %v1430_v1  ;;  %v1428_v63 = vpop.permute.xlu0 %1427  ;;  %4119 = vmatmul.mubr.msk.bf16.vlgmr.msra.gmra.mrb[0].mxu1 %vm438_vm3, %v5239_v21 }
 0x102   : > { %v1468_v58 = vsel %vm369_vm2, %v1449_v38, %v1428_v63  ;;  %4029 = vmatmul.mubr.msk.bf16.vlgmr.msra.gmra.mrb[0].mxu0 %vm438_vm3, %v5163_v35  ;;  %4127 = vmatpush3.bf16.msra.mxu1 %v1088_v15 }
 0x103   : > { %v5255_v40 = vcombine.low %v1468_v58, %v1470_v12  ;;  %4037 = vmatpush3.bf16.msra.mxu0 %v1088_v15  ;;  %4032 = vmatprep.mubr.msk.bf16.mxu0 %vm438_vm3, %v5180_v8  ;;  %v5281_v60 = vcombine.low %v1466_v37, %v1468_v58  ;;  %v5787_v15 = vld [vmem:[#allocation5_spill] sm:$0xff]  ;;  %v5789_v58 = vld [vmem:[#allocation7_spill] sm:$0xff] }
 0x104   : > { %v1434_v26 = vpop.permute.xlu1 %1433  ;;  %4309 = vmatprep.subr.msk.bf16.mxu0 %vm451_vm0, %v4446_v6  ;;  %4318 = vmatprep.subr.msk.bf16.mxu1 %vm451_vm0, %v4446_v6  ;;  %v5788_v6 = vld [vmem:[#allocation6_spill] sm:$0xff] }
 0x105   : > { %v1474_v25 = vsel %vm369_vm2, %v1458_v43, %v1434_v26  ;;  %4122 = vmatprep.mubr.msk.bf16.mxu1 %vm438_vm3, %v5255_v40  ;;  %v1432_v18 = vpop.permute.xlu0 %1431 }
 0x106   : > { %v1472_v62 = vsel %vm369_vm2, %v1455_v59, %v1432_v18 }
 0x107   : > { %v5269_v27 = vcombine.low %v1472_v62, %v1474_v25  ;;  %v5291_v4 = vcombine.low %v1470_v12, %v1472_v62 }
 0x108   : > { %v1607_v52 = vpop.permute.xlu1 %1606 }
 0x109   : > { %v1604_v55 = vpop.permute.xlu0 %1603  ;;  %4123 = vmatmul.mubr.msk.bf16.gmra.mrb[4].mxu1 %vm438_vm3, %v5269_v27 }
 0x10a   : > { %4033 = vmatmul.mubr.msk.bf16.gmra.mrb[4].mxu0 %vm438_vm3, %v5188_v10  ;;  %4128 = vmatprep.mubr.msk.bf16.mxu1 %vm438_vm3, %v5271_v22  ;;  %v1610_v39 = vsel %vm344_vm1, %v4912_v34, %v1604_v55 }
 0x10b   : > { %4038 = vmatprep.mubr.msk.bf16.mxu0 %vm438_vm3, %v5048_v9  ;;  %v1612_v9 = vsel %vm369_vm2, %v1610_v39, %v1607_v52 }
 0x10c   : > { %v1731_v54 = vpop.permute.xlu1 %1730  ;;  %v5302_v44 = vcombine.low %v1474_v25, %v1612_v9 }
 0x10d   : > { %v1728_v46 = vpop.permute.xlu0 %1727 }
 0x10e   : > { %v1734_v61 = vsel %vm344_vm1, %v4919_v28, %v1728_v46 }
 0x10f   : > { %v1736_v28 = vsel %vm369_vm2, %v1734_v61, %v1731_v54 }
 0x110   : > { %v2693_v5 = vpop.permute.xlu1 %2692 }
 0x111   : > { %v2691_v24 = vpop.permute.xlu0 %2690  ;;  %4129 = vmatmul.mubr.msk.bf16.vlgmr.msra.gmra.mrb[0].mxu1 %vm438_vm3, %v5281_v60 }
 0x112   : > { %4039 = vmatmul.mubr.msk.bf16.vlgmr.msra.gmra.mrb[0].mxu0 %vm438_vm3, %v5097_v30  ;;  %4137 = vmatpush3.bf16.msra.mxu1 %v1200_v2 }
 0x113   : > { %4047 = vmatpush3.bf16.msra.mxu0 %v1200_v2  ;;  %4042 = vmatprep.mubr.msk.bf16.mxu0 %vm438_vm3, %v5125_v0 }
 0x114   : > { %4132 = vmatprep.mubr.msk.bf16.mxu1 %vm438_vm3, %v5291_v4  ;;  %v2697_v34 = vpop.permute.xlu1 %2696  ;;  %4310 = vmatprep.subr.msk.bf16.mxu0 %vm451_vm0, %v4447_v47 }
 0x115   : > { %v2695_v7 = vpop.permute.xlu0 %2694  ;;  %4319 = vmatprep.subr.msk.bf16.mxu1 %vm451_vm0, %v4447_v47 }
 0x116   : > { %v2738_v17 = vsel %vm344_vm1, %v4946_v23, %v2695_v7  ;;  %v1640_v23 = vsel %vm451_vm0, %v4448_v29, 0 }
 0x118   : > { %v2717_v3 = vpop.permute.xlu1 %2716 }
 0x119   : > { %v2715_v30 = vpop.permute.xlu0 %2714  ;;  %4133 = vmatmul.mubr.msk.bf16.gmra.mrb[4].mxu1 %vm438_vm3, %v5302_v44 }
 0x11a   : > { %4043 = vmatmul.mubr.msk.bf16.gmra.mrb[4].mxu0 %vm438_vm3, %v5148_v20  ;;  %4138 = vmatprep.mubr.msk.bf16.mxu1 %vm438_vm3, %v5239_v21  ;;  %v2732_v20 = vsel %vm344_vm1, %v4930_v56, %v2691_v24 }
 0x11b   : > { %4048 = vmatprep.mubr.msk.bf16.mxu0 %vm438_vm3, %v5163_v35  ;;  %v2735_v35 = vsel %vm344_vm1, %v4926_v53, %v2693_v5  ;;  %v2755_v56 = vsel %vm369_vm2, %v2732_v20, %v2715_v30 }
 0x11c   : > { %v2721_v0 = vpop.permute.xlu1 %2720  ;;  %v2757_v36 = vsel %vm369_vm2, %v2735_v35, %v2717_v3 }
 0x11d   : > { %v2719_v14 = vpop.permute.xlu0 %2718  ;;  %v3876_v11 = vcombine.low %v2755_v56, %v2757_v36 }
 0x11e   : > { %v2759_v13 = vsel %vm369_vm2, %v2738_v17, %v2719_v14 }
 0x11f   : > { %v3885_v62 = vcombine.low %v2757_v36, %v2759_v13 }
 0x120   : > { %v2701_v33 = vpop.permute.xlu1 %2700 }
 0x121   : > { %v2699_v48 = vpop.permute.xlu0 %2698  ;;  %4139 = vmatmul.mubr.msk.bf16.vlgmr.msra.gmra.mrb[0].mxu1 %vm438_vm3, %v5255_v40 }
 0x122   : > { %4049 = vmatmul.mubr.msk.bf16.vlgmr.msra.gmra.mrb[0].mxu0 %vm438_vm3, %v5180_v8  ;;  %4147 = vmatpush3.bf16.msra.mxu1 %v1516_v31  ;;  %v5335_v8 = vcombine.low %v1612_v9, %v1736_v28  ;;  %v1839_v9 = vlaneseq }
 0x123   : > { %4057 = vmatpush3.bf16.msra.mxu0 %v1516_v31  ;;  %4052 = vmatprep.mubr.msk.bf16.mxu0 %vm438_vm3, %v5188_v10  ;;  %v2741_v10 = vsel %vm344_vm1, %v4938_v51, %v2697_v34  ;;  %v2747_v51 = vsel %vm344_vm1, %v4970_v19, %v2701_v33 }
 0x124   : > { %4142 = vmatprep.mubr.msk.bf16.mxu1 %vm438_vm3, %v5269_v27  ;;  %4311 = vmatprep.subr.msk.bf16.mxu0 %vm451_vm0, %v4448_v29  ;;  %v2705_v53 = vpop.permute.xlu1 %2704  ;;  %v2761_v41 = vsel %vm369_vm2, %v2741_v10, %v2721_v0  ;;  %v5408_v7 = vshrl.u32 %v1839_v9, 7 }
 0x125   : > { %4320 = vmatprep.subr.msk.bf16.mxu1 %vm451_vm0, %v4448_v29  ;;  %v2703_v49 = vpop.permute.xlu0 %2702  ;;  %v3877_v45 = vcombine.low %v2759_v13, %v2761_v41  ;;  %v2753_v38 = vsel %vm344_vm1, %v5788_v6, %v2705_v53 }
 0x126   : > { %v2750_v43 = vsel %vm344_vm1, %v5789_v58, %v2703_v49 }
 0x128   : > { %v2725_v37 = vpop.permute.xlu1 %2724 }
 0x129   : > { %4143 = vmatmul.mubr.msk.bf16.gmra.mrb[4].mxu1 %vm438_vm3, %v5335_v8  ;;  %v2723_v32 = vpop.permute.xlu0 %2722  ;;  %v2765_v1 = vsel %vm369_vm2, %v2747_v51, %v2725_v37 }
 0x12a   : > { %4053 = vmatmul.mubr.msk.bf16.gmra.mrb[4].mxu0 %vm438_vm3, %v5221_v50  ;;  %4148 = vmatprep.mubr.msk.bf16.mxu1 %vm438_vm3, %v3876_v11  ;;  %v2744_v50 = vsel %vm344_vm1, %v5787_v15, %v2699_v48 }
 0x12b   : > { %4058 = vmatprep.mubr.msk.bf16.mxu0 %vm438_vm3, %v5224_v57  ;;  %v4449_v57 = vld [vmem:[%s5776_s1 + $0x40] sm:$0x3f]   ;;  %v2763_v19 = vsel %vm369_vm2, %v2744_v50, %v2723_v32 }
 0x12c   : > { %v2729_v12 = vpop.permute.xlu1 %2728  ;;  %v3878_v63 = vcombine.low %v2763_v19, %v2765_v1  ;;  %v3886_v55 = vcombine.low %v2761_v41, %v2763_v19  ;;  %v1752_v54 = vsel %vm451_vm0, %v4449_v57, 0 }
 0x12d   : > { %v2727_v26 = vpop.permute.xlu0 %2726  ;;  %v2769_v59 = vsel %vm369_vm2, %v2753_v38, %v2729_v12 }
 0x12e   : > { %v2767_v25 = vsel %vm369_vm2, %v2750_v43, %v2727_v26 }
 0x12f   : > { %v3879_v18 = vcombine.low %v2767_v25, %v2769_v59  ;;  %v3887_v5 = vcombine.low %v2765_v1, %v2767_v25 }
 0x130   : > { %v2891_v2 = vpop.permute.xlu1 %2890 }
 0x131   : > { %4149 = vmatmul.mubr.msk.bf16.vlgmr.msra.gmra.mrb[0].mxu1 %vm438_vm3, %v3877_v45  ;;  %v2888_v52 = vpop.permute.xlu0 %2887 }
 0x132   : > { %4059 = vmatmul.mubr.msk.bf16.vlgmr.msra.gmra.mrb[0].mxu0 %vm438_vm3, %v5239_v21  ;;  %4157 = vmatpush3.bf16.msra.mxu1 %v1640_v23  ;;  %v2894_v46 = vsel %vm344_vm1, %v5033_v16, %v2888_v52 }
 0x133   : > { %4067 = vmatpush3.bf16.msra.mxu0 %v1640_v23  ;;  %4062 = vmatprep.mubr.msk.bf16.mxu0 %vm438_vm3, %v5255_v40 }
 0x134   : > { %4152 = vmatprep.mubr.msk.bf16.mxu1 %vm438_vm3, %v3878_v63  ;;  %4312 = vmatprep.subr.msk.bf16.mxu0 %vm451_vm0, %v4449_v57  ;;  %v3004_v39 = vpop.permute.xlu1 %3003 }
 0x135   : > { %4321 = vmatprep.subr.msk.bf16.mxu1 %vm451_vm0, %v4449_v57  ;;  %v3001_v16 = vpop.permute.xlu0 %3000 }
 0x139   : > { %4153 = vmatmul.mubr.msk.bf16.gmra.mrb[4].mxu1 %vm438_vm3, %v3879_v18 }
 0x13a   : > { %4063 = vmatmul.mubr.msk.bf16.gmra.mrb[4].mxu0 %vm438_vm3, %v5269_v27  ;;  %4158 = vmatprep.mubr.msk.bf16.mxu1 %vm438_vm3, %v3885_v62 }
 0x13b   : > { %4068 = vmatprep.mubr.msk.bf16.mxu0 %vm438_vm3, %v5271_v22  ;;  %v2896_v22 = vsel %vm369_vm2, %v2894_v46, %v2891_v2 }
 0x13c   : > { %v3888_v47 = vcombine.low %v2769_v59, %v2896_v22 }
 0x141   : > { %4159 = vmatmul.mubr.msk.bf16.vlgmr.msra.gmra.mrb[0].mxu1 %vm438_vm3, %v3886_v55 }
 0x142   : > { %4069 = vmatmul.mubr.msk.bf16.vlgmr.msra.gmra.mrb[0].mxu0 %vm438_vm3, %v5281_v60  ;;  %4167 = vmatpush3.bf16.msra.mxu1 %v1752_v54  ;;  %v3007_v60 = vsel %vm344_vm1, %v5054_v42, %v3001_v16  ;;  %v4548_v42 = vmov 1983009808  }
 0x143   : > { %4077 = vmatpush3.bf16.msra.mxu0 %v1752_v54  ;;  %4072 = vmatprep.mubr.msk.bf16.mxu0 %vm438_vm3, %v5291_v4  ;;  %v3009_v24 = vsel %vm369_vm2, %v3007_v60, %v3004_v39 }
 0x144   : > { %4162 = vmatprep.mubr.msk.bf16.mxu1 %vm438_vm3, %v3887_v5  ;;  %v3894_v4 = vcombine.low %v2896_v22, %v3009_v24 }
 0x149   : > { %4163 = vmatmul.mubr.msk.bf16.gmra.mrb[4].mxu1 %vm438_vm3, %v3888_v47 }
 0x14a   : > { %4073 = vmatmul.mubr.msk.bf16.gmra.mrb[4].mxu0 %vm438_vm3, %v5302_v44  ;;  %4168 = vmatprep.mubr.msk.bf16.mxu1 %vm438_vm3, %v3877_v45 }
 0x14b   : > { %4078 = vmatprep.mubr.msk.bf16.mxu0 %vm438_vm3, %v5239_v21  ;;  %v1837_v21 = vunpack.c.l.s4 %v4548_v42 }
 0x14d   : > { %v1838_v34 = vunpack.c.0.s8 %v1837_v21 }
 0x151   : > { %4169 = vmatmul.mubr.msk.bf16.vlgmr.msra.gmra.mrb[0].mxu1 %vm438_vm3, %v3878_v63 }
 0x152   : > { %4079 = vmatmul.mubr.msk.bf16.vlgmr.msra.gmra.mrb[0].mxu0 %vm438_vm3, %v5255_v40  ;;  %4172 = vmatprep.mubr.msk.bf16.mxu1 %vm438_vm3, %v3879_v18  ;;  %v5411_v40 = vsub.s32 %v1838_v34, %v5408_v7 }
 0x153   : > { %4082 = vmatprep.mubr.msk.bf16.mxu0 %vm438_vm3, %v5269_v27 }
 0x159   : > { %4173 = vmatmul.mubr.msk.bf16.gmra.mrb[4].mxu1 %vm438_vm3, %v3894_v4 }
 0x15a   : > { %4083 = vmatmul.mubr.msk.bf16.gmra.mrb[4].mxu0 %vm438_vm3, %v5335_v8 }
 0x224   : > { %v4170_v44 = vpop.f32.mrb[0].mxu1 }
 0x225   : > { %v4080_v3 = vpop.f32.mrb[0].mxu0  ;;  %v3131_v27 = vcombine.high %v4170_v44, %v4170_v44  ;;  %v3138_v30 = vrot.slane %v4170_v44, %v5411_v40  ;;  %v3050_v0 = vpop.f32.mrb[1].mxu1 }
 0x226   : > { %v1869_v14 = vcombine.high %v4080_v3, %v4080_v3  ;;  %v1876_v31 = vrot.slane %v4080_v3, %v5411_v40  ;;  %v1788_v33 = vpop.f32.mrb[1].mxu0  ;;  %v4171_v29 = vpop.f32.mrb[2].mxu1  ;;  %v3097_v35 = vcombine.high %v3050_v0, %v3050_v0  ;;  %v3104_v49 = vrot.slane %v3050_v0, %v5411_v40 }
 0x227   : > { %v3145_v61 = vrot.slane %v3131_v27, %v5411_v40  ;;  %v3146_v48 = vcombine.high %v3138_v30, %v3138_v30  ;;  %v1835_v20 = vcombine.high %v1788_v33, %v1788_v33  ;;  %v4081_v28 = vpop.f32.mrb[2].mxu0  ;;  %v5416_v56 = vpop.f32.mrb[3].mxu1  ;;  %v1842_v8 = vrot.slane %v1788_v33, %v5411_v40 }
 0x228   : > { %v1883_v36 = vrot.slane %v1869_v14, %v5411_v40  ;;  %v1884_v53 = vcombine.high %v1876_v31, %v1876_v31  ;;  %v5421_v11 = vpop.f32.mrb[3].mxu0  ;;  %v2040_v10 = vsel %vm2003_vm4, %v1876_v31, -inf  ;;  %v3301_v37 = vsel %vm2003_vm4, %v3138_v30, -inf }
 0x229   : > { %v3147_v17 = vcombine.high %v3145_v61, %v3145_v61  ;;  %v1849_v41 = vrot.slane %v1835_v20, %v5411_v40  ;;  %v3310_v32 = vsel %vm2003_vm4, %v3146_v48, -inf  ;;  %v3319_v13 = vsel %vm2003_vm4, %v3145_v61, -inf }
 0x22a   : > { %v1885_v51 = vcombine.high %v1883_v36, %v1883_v36  ;;  %v1850_v15 = vcombine.high %v1842_v8, %v1842_v8  ;;  %v2049_v50 = vsel %vm2003_vm4, %v1884_v53, -inf  ;;  %v2058_v45 = vsel %vm2003_vm4, %v1883_v36, -inf }
 0x22b   : > { %v3328_v1 = vsel %vm2003_vm4, %v3147_v17, -inf  ;;  %v1851_v23 = vcombine.high %v1849_v41, %v1849_v41  ;;  %v5432_v57 = vsel %vm2003_vm4, %v1842_v8, -inf  ;;  %v5435_v6 = vsel %vm2003_vm4, %v1849_v41, -inf }
 0x22c   : > { %v5438_v38 = vrot.slane %v3097_v35, %v5411_v40  ;;  %v3112_v19 = vcombine.high %v3104_v49, %v3104_v49  ;;  %v5440_v12 = vpop.f32.mrb[4].mxu1  ;;  %v2067_v63 = vsel %vm2003_vm4, %v1885_v51, -inf  ;;  %v5444_v58 = vsel %vm2003_vm4, %v1850_v15, -inf }
 0x22d   : > { %v1886_v43 = vcombine.high %v4081_v28, %v4081_v28  ;;  %v1893_v26 = vrot.slane %v4081_v28, %v5411_v40  ;;  %v5447_v59 = vpop.f32.mrb[4].mxu0  ;;  %v5449_v25 = vpop.f32.mrb[5].mxu1  ;;  %v5452_v18 = vsel %vm2003_vm4, %v1851_v23, -inf  ;;  %v5457_v52 = vsel %vm2003_vm4, %v3104_v49, -inf }
 0x22e   : > { %v3113_v62 = vcombine.high %v5438_v38, %v5438_v38  ;;  %v3148_v55 = vcombine.high %v4171_v29, %v4171_v29  ;;  %v5459_v54 = vpop.f32.mrb[5].mxu0  ;;  %v5461_v46 = vpop.f32.mrb[6].mxu1  ;;  %v3155_v47 = vrot.slane %v4171_v29, %v5411_v40  ;;  %v5471_v39 = vsel %vm2003_vm4, %v3112_v19, -inf }
 0x22f   : > { %v1900_v2 = vrot.slane %v1886_v43, %v5411_v40  ;;  %v1901_v5 = vcombine.high %v1893_v26, %v1893_v26  ;;  %v2041_v22 = vsel %vm2003_vm4, %v1893_v26, -inf  ;;  %v5466_v16 = vpop.f32.mrb[6].mxu0  ;;  %v5468_v60 = vpop.f32.mrb[7].mxu1  ;;  %v1852_v42 = vcombine.high %v5421_v11, %v5421_v11 }
 0x230   : > { %v2042_v24 = vmax.f32 %v2040_v10, %v2041_v22  ;;  %v3162_v4 = vrot.slane %v3148_v55, %v5411_v40  ;;  %v5476_v21 = vpop.f32.mrb[7].mxu0  ;;  %v3163_v3 = vcombine.high %v3155_v47, %v3155_v47  ;;  %v3302_v33 = vsel %vm2003_vm4, %v3155_v47, -inf }
 0x231   : > { %v1902_v9 = vcombine.high %v1900_v2, %v1900_v2  ;;  %v2050_v34 = vsel %vm2003_vm4, %v1901_v5, -inf  ;;  %v2059_v44 = vsel %vm2003_vm4, %v1900_v2, -inf  ;;  %v3303_v36 = vmax.f32 %v3301_v37, %v3302_v33 }
 0x232   : > { %v2043_v27 = vrot.slane %v2042_v24, 4  ;;  %v2051_v30 = vmax.f32 %v2049_v50, %v2050_v34  ;;  %v2060_v0 = vmax.f32 %v2058_v45, %v2059_v44  ;;  %v3164_v14 = vcombine.high %v3162_v4, %v3162_v4 }
 0x233   : > { %v2068_v31 = vsel %vm2003_vm4, %v1902_v9, -inf  ;;  %v3311_v29 = vsel %vm2003_vm4, %v3163_v3, -inf  ;;  %v3320_v61 = vsel %vm2003_vm4, %v3162_v4, -inf  ;;  %v3304_v15 = vrot.slane %v3303_v36, 4 }
 0x234   : > { %v2044_v48 = vmax.f32 %v2042_v24, %v2043_v27  ;;  %v2052_v20 = vrot.slane %v2051_v30, 4  ;;  %v2061_v35 = vrot.slane %v2060_v0, 4  ;;  %v2069_v28 = vmax.f32 %v2067_v63, %v2068_v31 }
 0x235   : > { %v3312_v53 = vmax.f32 %v3310_v32, %v3311_v29  ;;  %v3321_v8 = vmax.f32 %v3319_v13, %v3320_v61  ;;  %v3329_v49 = vsel %vm2003_vm4, %v3164_v14, -inf  ;;  %v3305_v2 = vmax.f32 %v3303_v36, %v3304_v15 }
 0x236   : > { %v2045_v10 = vrot.slane %v2044_v48, 2  ;;  %v2053_v17 = vmax.f32 %v2051_v30, %v2052_v20  ;;  %v2062_v41 = vmax.f32 %v2060_v0, %v2061_v35  ;;  %v2070_v51 = vrot.slane %v2069_v28, 4 }
 0x237   : > { %v3313_v50 = vrot.slane %v3312_v53, 4  ;;  %v3322_v45 = vrot.slane %v3321_v8, 4  ;;  %v3330_v23 = vmax.f32 %v3328_v1, %v3329_v49  ;;  %v3306_v24 = vrot.slane %v3305_v2, 2 }
 0x238   : > { %v2046_v19 = vmax.f32 %v2044_v48, %v2045_v10  ;;  %v2054_v43 = vrot.slane %v2053_v17, 2  ;;  %v2063_v26 = vrot.slane %v2062_v41, 2  ;;  %v2071_v55 = vmax.f32 %v2069_v28, %v2070_v51 }
 0x239   : > { %v3314_v5 = vmax.f32 %v3312_v53, %v3313_v50  ;;  %v3323_v63 = vmax.f32 %v3321_v8, %v3322_v45  ;;  %v3331_v37 = vrot.slane %v3330_v23, 4  ;;  %v3307_v30 = vmax.f32 %v3305_v2, %v3306_v24 }
 0x23a   : > { %v2047_v32 = vrot.slane %v2046_v19, 1  ;;  %v2055_v13 = vmax.f32 %v2053_v17, %v2054_v43  ;;  %v2064_v22 = vmax.f32 %v2062_v41, %v2063_v26  ;;  %v2072_v47 = vrot.slane %v2071_v55, 2 }
 0x23b   : > { %v3315_v4 = vrot.slane %v3314_v5, 2  ;;  %v3324_v9 = vrot.slane %v3323_v63, 2  ;;  %v3332_v34 = vmax.f32 %v3330_v23, %v3331_v37  ;;  %v1859_v48 = vrot.slane %v5421_v11, %v5411_v40 }
 0x23c   : > { %v2048_v44 = vmax.f32 %v2046_v19, %v2047_v32  ;;  %v2056_v3 = vrot.slane %v2055_v13, 1  ;;  %v2065_v27 = vrot.slane %v2064_v22, 1  ;;  %v2073_v1 = vmax.f32 %v2071_v55, %v2072_v47 }
 0x23d   : > { %v3316_v0 = vmax.f32 %v3314_v5, %v3315_v4  ;;  %v3325_v14 = vmax.f32 %v3323_v63, %v3324_v9  ;;  %v3333_v31 = vrot.slane %v3332_v34, 2  ;;  %v3308_v20 = vrot.slane %v3307_v30, 1 }
 0x23e   : > { %v2057_v33 = vmax.f32 %v2055_v13, %v2056_v3  ;;  %v2066_v29 = vmax.f32 %v2064_v22, %v2065_v27  ;;  %v2074_v61 = vrot.slane %v2073_v1, 1  ;;  %v1866_v8 = vrot.slane %v1852_v42, %v5411_v40  ;;  %v5502_v42 = vld [vmem:[%s5777_s2] ss:$0 sm:$0xff] }
 0x23f   : > { %v3317_v35 = vrot.slane %v3316_v0, 1  ;;  %v3326_v28 = vrot.slane %v3325_v14, 1  ;;  %v3334_v36 = vmax.f32 %v3332_v34, %v3333_v31  ;;  %v1867_v49 = vcombine.high %v1859_v48, %v1859_v48 }
 0x240   : > { %v5487_v53 = vmax.f32 %v2073_v1, %v2074_v61  ;;  %v2005_v10 = vsel %vm2003_vm4, %v1859_v48, -inf  ;;  %v3309_v17 = vmax.f32 %v3307_v30, %v3308_v20  ;;  %v1868_v50 = vcombine.high %v1866_v8, %v1866_v8 }
 0x241   : > { %v3318_v41 = vmax.f32 %v3316_v0, %v3317_v35  ;;  %v3327_v51 = vmax.f32 %v3325_v14, %v3326_v28  ;;  %v3335_v15 = vrot.slane %v3334_v36, 1  ;;  %v2006_v45 = vmax.f32 %v5432_v57, %v2005_v10 }
 0x242   : > { %v2014_v23 = vsel %vm2003_vm4, %v1867_v49, -inf  ;;  %v2023_v19 = vsel %vm2003_vm4, %v1866_v8, -inf  ;;  %v3413_v26 = vmax.f32 %v2048_v44, %v3309_v17  ;;  %v2032_v57 = vsel %vm2003_vm4, %v1868_v50, -inf }
 0x243   : > { %v5497_v43 = vmax.f32 %v3334_v36, %v3335_v15  ;;  %v3414_v55 = vmax.f32 %v2057_v33, %v3318_v41  ;;  %v3415_v11 = vmax.f32 %v2066_v29, %v3327_v51  ;;  %v2007_v2 = vrot.slane %v2006_v45, 4 }
 0x244   : > { %v2015_v5 = vmax.f32 %v5444_v58, %v2014_v23  ;;  %v2024_v63 = vmax.f32 %v5435_v6, %v2023_v19  ;;  %v3283_v37 = vsel %vm2003_vm4, %v5438_v38, -inf  ;;  %v3292_v32 = vsel %vm2003_vm4, %v3113_v62, -inf }
 0x245   : > { %v3416_v13 = vmax.f32 %v5487_v53, %v5497_v43  ;;  %v5516_v22 = vadd.f32 %v5502_v42, %v3414_v55  ;;  %v2008_v47 = vmax.f32 %v2006_v45, %v2007_v2  ;;  %v2033_v6 = vmax.f32 %v5452_v18, %v2032_v57 }
 0x246   : > { %v2016_v58 = vrot.slane %v2015_v5, 4  ;;  %v2025_v24 = vrot.slane %v2024_v63, 4  ;;  %v5520_v4 = vadd.f32 %v5502_v42, %v3413_v26  ;;  %v5523_v9 = vadd.f32 %v5502_v42, %v3415_v11 }
 0x247   : > { %v3114_v38 = vcombine.high %v5416_v56, %v5416_v56  ;;  %v3121_v62 = vrot.slane %v5416_v56, %v5411_v40  ;;  %v2009_v34 = vrot.slane %v2008_v47, 2  ;;  %v2034_v27 = vrot.slane %v2033_v6, 4 }
 0x248   : > { %v2017_v44 = vmax.f32 %v2015_v5, %v2016_v58  ;;  %v2026_v3 = vmax.f32 %v2024_v63, %v2025_v24  ;;  %v3473_v1 = vrot.slane %v5516_v22, 7  ;;  %v3475_v55 = vrot.slane %v5523_v9, 6 }
 0x249   : > { %v3128_v18 = vrot.slane %v3114_v38, %v5411_v40  ;;  %v3129_v30 = vcombine.high %v3121_v62, %v3121_v62  ;;  %v3266_v0 = vsel %vm2003_vm4, %v3121_v62, -inf  ;;  %v2010_v14 = vmax.f32 %v2008_v47, %v2009_v34 }
 0x24a   : > { %v2018_v31 = vrot.slane %v2017_v44, 2  ;;  %v2027_v33 = vrot.slane %v2026_v3, 2  ;;  %v2035_v29 = vmax.f32 %v2033_v6, %v2034_v27  ;;  %v3267_v48 = vmax.f32 %v5457_v52, %v3266_v0 }
 0x24b   : > { %v3130_v61 = vcombine.high %v3128_v18, %v3128_v18  ;;  %v3275_v56 = vsel %vm2003_vm4, %v3129_v30, -inf  ;;  %v3284_v20 = vsel %vm2003_vm4, %v3128_v18, -inf  ;;  %v2011_v35 = vrot.slane %v2010_v14, 1 }
 0x24c   : > { %v2019_v28 = vmax.f32 %v2017_v44, %v2018_v31  ;;  %v2028_v36 = vmax.f32 %v2026_v3, %v2027_v33  ;;  %v2036_v8 = vrot.slane %v2035_v29, 2  ;;  %v3268_v49 = vrot.slane %v3267_v48, 4 }
 0x24d   : > { %v3276_v10 = vmax.f32 %v5471_v39, %v3275_v56  ;;  %v3285_v17 = vmax.f32 %v3283_v37, %v3284_v20  ;;  %v3293_v41 = vsel %vm2003_vm4, %v3130_v61, -inf  ;;  %v1937_v52 = vcombine.high %v5447_v59, %v5447_v59 }
 0x24e   : > { %v2020_v51 = vrot.slane %v2019_v28, 1  ;;  %v2029_v15 = vrot.slane %v2028_v36, 1  ;;  %v2037_v50 = vmax.f32 %v2035_v29, %v2036_v8  ;;  %v3269_v45 = vmax.f32 %v3267_v48, %v3268_v49 }
 0x24f   : > { %v3277_v23 = vrot.slane %v3276_v10, 4  ;;  %v3286_v19 = vrot.slane %v3285_v17, 4  ;;  %v3294_v26 = vmax.f32 %v3292_v32, %v3293_v41  ;;  %v2012_v11 = vmax.f32 %v2010_v14, %v2011_v35 }
 0x250   : > { %v2038_v2 = vrot.slane %v2037_v50, 1  ;;  %v1944_v39 = vrot.slane %v5447_v59, %v5411_v40  ;;  %v3270_v5 = vrot.slane %v3269_v45, 2  ;;  %v2021_v47 = vmax.f32 %v2019_v28, %v2020_v51 }
 0x251   : > { %v3278_v63 = vmax.f32 %v3276_v10, %v3277_v23  ;;  %v3287_v57 = vmax.f32 %v3285_v17, %v3286_v19  ;;  %v3295_v37 = vrot.slane %v3294_v26, 4  ;;  %v2030_v58 = vmax.f32 %v2028_v36, %v2029_v15 }
 0x252   : > { %v1951_v24 = vrot.slane %v1937_v52, %v5411_v40  ;;  %v1952_v6 = vcombine.high %v1944_v39, %v1944_v39  ;;  %v3271_v38 = vmax.f32 %v3269_v45, %v3270_v5  ;;  %v5543_v44 = vmax.f32 %v2037_v50, %v2038_v2 }
 0x253   : > { %v3279_v62 = vrot.slane %v3278_v63, 2  ;;  %v3288_v34 = vrot.slane %v3287_v57, 2  ;;  %v3296_v32 = vmax.f32 %v3294_v26, %v3295_v37  ;;  %v2112_v27 = vsel %vm2003_vm4, %v1944_v39, -inf }
 0x254   : > { %v1953_v3 = vcombine.high %v1951_v24, %v1951_v24  ;;  %v3199_v59 = vcombine.high %v5440_v12, %v5440_v12  ;;  %v3272_v18 = vrot.slane %v3271_v38, 1  ;;  %v2121_v31 = vsel %vm2003_vm4, %v1952_v6, -inf }
 0x255   : > { %v3280_v30 = vmax.f32 %v3278_v63, %v3279_v62  ;;  %v3289_v0 = vmax.f32 %v3287_v57, %v3288_v34  ;;  %v3297_v14 = vrot.slane %v3296_v32, 2  ;;  %v3206_v33 = vrot.slane %v5440_v12, %v5411_v40 }
 0x256   : > { %v3213_v29 = vrot.slane %v3199_v59, %v5411_v40  ;;  %v1903_v61 = vcombine.high %v5459_v54, %v5459_v54  ;;  %v3273_v48 = vmax.f32 %v3271_v38, %v3272_v18  ;;  %v2130_v28 = vsel %vm2003_vm4, %v1951_v24, -inf }
 0x257   : > { %v3281_v56 = vrot.slane %v3280_v30, 1  ;;  %v3290_v20 = vrot.slane %v3289_v0, 1  ;;  %v3298_v35 = vmax.f32 %v3296_v32, %v3297_v14  ;;  %v2139_v36 = vsel %vm2003_vm4, %v1953_v3, -inf }
 0x258   : > { %v3214_v8 = vcombine.high %v3206_v33, %v3206_v33  ;;  %v3215_v49 = vcombine.high %v3213_v29, %v3213_v29  ;;  %v3409_v51 = vmax.f32 %v2012_v11, %v3273_v48  ;;  %v3373_v12 = vsel %vm2003_vm4, %v3206_v33, -inf }
 0x259   : > { %v3282_v10 = vmax.f32 %v3280_v30, %v3281_v56  ;;  %v3291_v17 = vmax.f32 %v3289_v0, %v3290_v20  ;;  %v3299_v41 = vrot.slane %v3298_v35, 1  ;;  %v3391_v15 = vsel %vm2003_vm4, %v3213_v29, -inf }
 0x25a   : > { %v1910_v50 = vrot.slane %v5459_v54, %v5411_v40  ;;  %v1917_v52 = vrot.slane %v1903_v61, %v5411_v40  ;;  %v3382_v26 = vsel %vm2003_vm4, %v3214_v8, -inf  ;;  %v5565_v2 = vadd.f32 %v5502_v42, %v3409_v51 }
 0x25b   : > { %v5561_v45 = vmax.f32 %v3298_v35, %v3299_v41  ;;  %v3410_v23 = vmax.f32 %v2021_v47, %v3282_v10  ;;  %v3411_v19 = vmax.f32 %v2030_v58, %v3291_v17  ;;  %v3400_v11 = vsel %vm2003_vm4, %v3215_v49, -inf }
 0x25c   : > { %v1918_v39 = vcombine.high %v1910_v50, %v1910_v50  ;;  %v1919_v5 = vcombine.high %v1917_v52, %v1917_v52  ;;  %v3165_v37 = vcombine.high %v5449_v25, %v5449_v25  ;;  %v5579_v47 = vsel %vm2003_vm4, %v1910_v50, -inf }
 0x25d   : > { %v3412_v63 = vmax.f32 %v5543_v44, %v5561_v45  ;;  %v5571_v54 = vadd.f32 %v5502_v42, %v3410_v23  ;;  %v5574_v57 = vadd.f32 %v5502_v42, %v3411_v19  ;;  %v5582_v58 = vsel %vm2003_vm4, %v1917_v52, -inf }
 0x25e   : > { %v5586_v24 = vrot.slane %v5449_v25, %v5411_v40  ;;  %v1954_v6 = vcombine.high %v5466_v16, %v5466_v16  ;;  %v5591_v38 = vsel %vm2003_vm4, %v1918_v39, -inf  ;;  %v5594_v62 = vsel %vm2003_vm4, %v1919_v5, -inf }
 0x25f   : > { %v5597_v34 = vrot.slane %v3165_v37, %v5411_v40  ;;  %v1961_v32 = vrot.slane %v5466_v16, %v5411_v40  ;;  %v3464_v3 = vrot.slane %v5571_v54, 7  ;;  %v3467_v25 = vrot.slane %v5574_v57, 6 }
 0x260   : > { %v1968_v59 = vrot.slane %v1954_v6, %v5411_v40  ;;  %v3216_v18 = vcombine.high %v5461_v46, %v5461_v46  ;;  %v3180_v30 = vcombine.high %v5586_v24, %v5586_v24  ;;  %v5610_v0 = vsel %vm2003_vm4, %v5586_v24, -inf }
 0x261   : > { %v1969_v14 = vcombine.high %v1961_v32, %v1961_v32  ;;  %v2113_v33 = vsel %vm2003_vm4, %v1961_v32, -inf  ;;  %v3181_v16 = vcombine.high %v5597_v34, %v5597_v34  ;;  %v5618_v56 = vsel %vm2003_vm4, %v5597_v34, -inf }
 0x262   : > { %v1970_v29 = vcombine.high %v1968_v59, %v1968_v59  ;;  %v2114_v61 = vmax.f32 %v2112_v27, %v2113_v33  ;;  %v2131_v48 = vsel %vm2003_vm4, %v1968_v59, -inf  ;;  %v3223_v8 = vrot.slane %v5461_v46, %v5411_v40 }
 0x263   : > { %v2122_v20 = vsel %vm2003_vm4, %v1969_v14, -inf  ;;  %v2132_v35 = vmax.f32 %v2130_v28, %v2131_v48  ;;  %v3230_v41 = vrot.slane %v3216_v18, %v5411_v40  ;;  %v3466_v44 = vsel %vm3465_vm5, %v3464_v3, %v5565_v2 }
 0x264   : > { %v2115_v49 = vrot.slane %v2114_v61, 4  ;;  %v2123_v10 = vmax.f32 %v2121_v31, %v2122_v20  ;;  %v2140_v17 = vsel %vm2003_vm4, %v1970_v29, -inf  ;;  %v3231_v50 = vcombine.high %v3223_v8, %v3223_v8 }
 0x265   : > { %v2133_v51 = vrot.slane %v2132_v35, 4  ;;  %v2141_v27 = vmax.f32 %v2139_v36, %v2140_v17  ;;  %v3374_v52 = vsel %vm2003_vm4, %v3223_v8, -inf  ;;  %v3232_v39 = vcombine.high %v3230_v41, %v3230_v41 }
 0x266   : > { %v2116_v23 = vmax.f32 %v2114_v61, %v2115_v49  ;;  %v2124_v19 = vrot.slane %v2123_v10, 4  ;;  %v3375_v5 = vmax.f32 %v3373_v12, %v3374_v52  ;;  %v3383_v24 = vsel %vm2003_vm4, %v3231_v50, -inf }
 0x267   : > { %v2134_v37 = vmax.f32 %v2132_v35, %v2133_v51  ;;  %v2142_v28 = vrot.slane %v2141_v27, 4  ;;  %v3392_v46 = vsel %vm2003_vm4, %v3230_v41, -inf  ;;  %v3384_v59 = vmax.f32 %v3382_v26, %v3383_v24 }
 0x268   : > { %v2117_v31 = vrot.slane %v2116_v23, 2  ;;  %v2125_v6 = vmax.f32 %v2123_v10, %v2124_v19  ;;  %v3376_v32 = vrot.slane %v3375_v5, 4  ;;  %v3393_v36 = vmax.f32 %v3391_v15, %v3392_v46 }
 0x269   : > { %v2135_v18 = vrot.slane %v2134_v37, 2  ;;  %v2143_v14 = vmax.f32 %v2141_v27, %v2142_v28  ;;  %v3401_v33 = vsel %vm2003_vm4, %v3232_v39, -inf  ;;  %v3385_v20 = vrot.slane %v3384_v59, 4 }
 0x26a   : > { %v2118_v29 = vmax.f32 %v2116_v23, %v2117_v31  ;;  %v2126_v61 = vrot.slane %v2125_v6, 2  ;;  %v3377_v48 = vmax.f32 %v3375_v5, %v3376_v32  ;;  %v3394_v8 = vrot.slane %v3393_v36, 4 }
 0x26b   : > { %v2136_v12 = vmax.f32 %v2134_v37, %v2135_v18  ;;  %v2144_v35 = vrot.slane %v2143_v14, 2  ;;  %v3402_v49 = vmax.f32 %v3400_v11, %v3401_v33  ;;  %v3386_v50 = vmax.f32 %v3384_v59, %v3385_v20 }
 0x26c   : > { %v2119_v17 = vrot.slane %v2118_v29, 1  ;;  %v2127_v51 = vmax.f32 %v2125_v6, %v2126_v61  ;;  %v3378_v41 = vrot.slane %v3377_v48, 2  ;;  %v3395_v26 = vmax.f32 %v3393_v36, %v3394_v8 }
 0x26d   : > { %v2137_v10 = vrot.slane %v2136_v12, 1  ;;  %v2145_v52 = vmax.f32 %v2143_v14, %v2144_v35  ;;  %v3403_v19 = vrot.slane %v3402_v49, 4  ;;  %v5630_v15 = vsel %vm2003_vm4, %v3180_v30, -inf }
 0x26e   : > { %v2128_v27 = vrot.slane %v2127_v51, 1  ;;  %v3379_v23 = vmax.f32 %v3377_v48, %v3378_v41  ;;  %v3387_v39 = vrot.slane %v3386_v50, 2  ;;  %v2120_v5 = vmax.f32 %v2118_v29, %v2119_v17 }
 0x26f   : > { %v2146_v28 = vrot.slane %v2145_v52, 1  ;;  %v3396_v37 = vrot.slane %v3395_v26, 2  ;;  %v3404_v24 = vmax.f32 %v3402_v49, %v3403_v19  ;;  %v2138_v46 = vmax.f32 %v2136_v12, %v2137_v10 }
 0x270   : > { %v3380_v11 = vrot.slane %v3379_v23, 1  ;;  %v3388_v31 = vmax.f32 %v3386_v50, %v3387_v39  ;;  %v1920_v6 = vcombine.high %v5476_v21, %v5476_v21  ;;  %v2129_v32 = vmax.f32 %v2127_v51, %v2128_v27 }
 0x271   : > { %v3397_v59 = vmax.f32 %v3395_v26, %v3396_v37  ;;  %v3405_v18 = vrot.slane %v3404_v24, 2  ;;  %v1927_v30 = vrot.slane %v5476_v21, %v5411_v40  ;;  %v5636_v14 = vmax.f32 %v2145_v52, %v2146_v28 }
 0x272   : > { %v3381_v36 = vmax.f32 %v3379_v23, %v3380_v11  ;;  %v3389_v33 = vrot.slane %v3388_v31, 1  ;;  %v1934_v29 = vrot.slane %v1920_v6, %v5411_v40  ;;  %v3182_v19 = vcombine.high %v5468_v60, %v5468_v60 }
 0x273   : > { %v3398_v61 = vrot.slane %v3397_v59, 1  ;;  %v3406_v48 = vmax.f32 %v3404_v24, %v3405_v18  ;;  %v1935_v20 = vcombine.high %v1927_v30, %v1927_v30  ;;  %v2077_v12 = vsel %vm2003_vm4, %v1927_v30, -inf }
 0x274   : > { %v3390_v35 = vmax.f32 %v3388_v31, %v3389_v33  ;;  %v3421_v8 = vmax.f32 %v2120_v5, %v3381_v36  ;;  %v1936_v49 = vcombine.high %v1934_v29, %v1934_v29  ;;  %v2078_v17 = vmax.f32 %v5579_v47, %v2077_v12 }
 0x275   : > { %v3399_v51 = vmax.f32 %v3397_v59, %v3398_v61  ;;  %v3407_v41 = vrot.slane %v3406_v48, 1  ;;  %v2086_v21 = vsel %vm2003_vm4, %v1935_v20, -inf  ;;  %v2095_v50 = vsel %vm2003_vm4, %v1934_v29, -inf }
 0x276   : > { %v3422_v10 = vmax.f32 %v2129_v32, %v3390_v35  ;;  %v2079_v52 = vrot.slane %v2078_v17, 4  ;;  %v2087_v26 = vmax.f32 %v5591_v38, %v2086_v21  ;;  %v2096_v39 = vmax.f32 %v5582_v58, %v2095_v50 }
 0x277   : > { %v3408_v27 = vmax.f32 %v3406_v48, %v3407_v41  ;;  %v3423_v23 = vmax.f32 %v2138_v46, %v3399_v51  ;;  %v2104_v5 = vsel %vm2003_vm4, %v1936_v49, -inf  ;;  %v3364_v47 = vsel %vm2003_vm4, %v3181_v16, -inf }
 0x278   : > { %v2080_v28 = vmax.f32 %v2078_v17, %v2079_v52  ;;  %v2088_v37 = vrot.slane %v2087_v26, 4  ;;  %v2105_v24 = vmax.f32 %v5594_v62, %v2104_v5  ;;  %v5655_v11 = vadd.f32 %v5502_v42, %v3421_v8 }
 0x279   : > { %v3424_v38 = vmax.f32 %v5636_v14, %v3408_v27  ;;  %v2097_v31 = vrot.slane %v2096_v39, 4  ;;  %v3189_v58 = vrot.slane %v5468_v60, %v5411_v40  ;;  %v5660_v46 = vadd.f32 %v5502_v42, %v3422_v10 }
 0x27a   : > { %v2081_v6 = vrot.slane %v2080_v28, 2  ;;  %v2089_v34 = vmax.f32 %v2087_v26, %v2088_v37  ;;  %v2106_v32 = vrot.slane %v2105_v24, 4  ;;  %v5663_v16 = vadd.f32 %v5502_v42, %v3423_v23 }
 0x27b   : > { %v2098_v62 = vmax.f32 %v2096_v39, %v2097_v31  ;;  %v3196_v59 = vrot.slane %v3182_v19, %v5411_v40  ;;  %v3197_v18 = vcombine.high %v3189_v58, %v3189_v58  ;;  %v3338_v60 = vsel %vm2003_vm4, %v3189_v58, -inf }
 0x27c   : > { %v2082_v30 = vmax.f32 %v2080_v28, %v2081_v6  ;;  %v2090_v14 = vrot.slane %v2089_v34, 2  ;;  %v2107_v36 = vmax.f32 %v2105_v24, %v2106_v32  ;;  %v3339_v61 = vmax.f32 %v5610_v0, %v3338_v60 }
 0x27d   : > { %v2099_v33 = vrot.slane %v2098_v62, 2  ;;  %v3198_v29 = vcombine.high %v3196_v59, %v3196_v59  ;;  %v3347_v48 = vsel %vm2003_vm4, %v3197_v18, -inf  ;;  %v3356_v51 = vsel %vm2003_vm4, %v3196_v59, -inf }
 0x27e   : > { %v2083_v20 = vrot.slane %v2082_v30, 1  ;;  %v2091_v12 = vmax.f32 %v2089_v34, %v2090_v14  ;;  %v2108_v35 = vrot.slane %v2107_v36, 2  ;;  %v3348_v8 = vmax.f32 %v5630_v15, %v3347_v48 }
 0x27f   : > { %v2100_v49 = vmax.f32 %v2098_v62, %v2099_v33  ;;  %v3340_v17 = vrot.slane %v3339_v61, 4  ;;  %v3365_v41 = vsel %vm2003_vm4, %v3198_v29, -inf  ;;  %v3485_v21 = vrot.slane %v5660_v46, 7 }
 0x280   : > { %v2092_v50 = vrot.slane %v2091_v12, 1  ;;  %v2109_v10 = vmax.f32 %v2107_v36, %v2108_v35  ;;  %v3349_v52 = vrot.slane %v3348_v8, 4  ;;  %v3487_v0 = vrot.slane %v5663_v16, 6 }
 0x281   : > { %v3341_v26 = vmax.f32 %v3339_v61, %v3340_v17  ;;  %v3357_v19 = vmax.f32 %v5618_v56, %v3356_v51  ;;  %v3366_v27 = vmax.f32 %v3364_v47, %v3365_v41  ;;  %v2084_v23 = vmax.f32 %v2082_v30, %v2083_v20 }
 0x282   : > { %v2101_v39 = vrot.slane %v2100_v49, 1  ;;  %v3350_v15 = vmax.f32 %v3348_v8, %v3349_v52  ;;  %v3435_v5 = vadd.f32 %v5502_v42, %v3412_v63  ;;  %v2093_v28 = vmax.f32 %v2091_v12, %v2092_v50 }
 0x283   : > { %v3342_v37 = vrot.slane %v3341_v26, 2  ;;  %v3358_v24 = vrot.slane %v3357_v19, 4  ;;  %v3367_v31 = vrot.slane %v3366_v27, 4  ;;  %v2110_v58 = vrot.slane %v2109_v10, 1 }
 0x284   : > { %v3351_v46 = vrot.slane %v3350_v15, 2  ;;  %v3439_v56 = vadd.f32 %v5502_v42, %v3416_v13  ;;  %v3447_v47 = vadd.f32 %v5502_v42, %v3424_v38  ;;  %v3469_v63 = vsel %vm3468_vm6, %v3467_v25, %v3466_v44 }
 0x285   : > { %v3343_v6 = vmax.f32 %v3341_v26, %v3342_v37  ;;  %v3359_v34 = vmax.f32 %v3357_v19, %v3358_v24  ;;  %v3368_v32 = vmax.f32 %v3366_v27, %v3367_v31  ;;  %v3470_v16 = vrot.slane %v3435_v5, 5 }
 0x286   : > { %v3352_v45 = vmax.f32 %v3350_v15, %v3351_v46  ;;  %v3474_v53 = vsel %vm3465_vm5, %v3473_v1, %v5520_v4  ;;  %v3477_v3 = vrot.slane %v3439_v56, 5  ;;  %v3486_v57 = vsel %vm3465_vm5, %v3485_v21, %v5655_v11 }
 0x287   : > { %v3344_v43 = vrot.slane %v3343_v6, 1  ;;  %v3360_v13 = vrot.slane %v3359_v34, 2  ;;  %v3369_v38 = vrot.slane %v3368_v32, 2  ;;  %v3476_v54 = vsel %vm3468_vm6, %v3475_v55, %v3474_v53 }
 0x288   : > { %v3353_v62 = vrot.slane %v3352_v45, 1  ;;  %v3472_v2 = vsel %vm3471_vm7, %v3470_v16, %v3469_v63  ;;  %v3488_v22 = vsel %vm3468_vm6, %v3487_v0, %v3486_v57  ;;  %v2102_v4 = vmax.f32 %v2100_v49, %v2101_v39 }
 0x289   : > { %v3345_v25 = vmax.f32 %v3343_v6, %v3344_v43  ;;  %v3361_v59 = vmax.f32 %v3359_v34, %v3360_v13  ;;  %v3370_v18 = vmax.f32 %v3368_v32, %v3369_v38  ;;  %v3478_v30 = vsel %vm3471_vm7, %v3477_v3, %v3476_v54 }
 0x28a   : > { %v3354_v1 = vmax.f32 %v3352_v45, %v3353_v62  ;;  %v3489_v14 = vrot.slane %v3447_v47, 5  ;;  %v2111_v9 = vmax.f32 %v2109_v10, %v2110_v58  ;;  %v4549_v41 = vmov 1934713408  }
 0x28b   : > { %v3362_v36 = vrot.slane %v3361_v59, 1  ;;  %v3371_v55 = vrot.slane %v3370_v18, 1  ;;  %v3417_v60 = vmax.f32 %v2084_v23, %v3345_v25  ;;  %v3514_v21 = vunpack.c.l.s4 %v4549_v41 }
 0x28c   : > { %v3418_v33 = vmax.f32 %v2093_v28, %v3354_v1  ;;  %v3490_v29 = vsel %vm3471_vm7, %v3489_v14, %v3488_v22  ;;  %v4551_v24 = vmov 0.0  }
 0x28d   : > { %v3363_v61 = vmax.f32 %v3361_v59, %v3362_v36  ;;  %v3372_v48 = vmax.f32 %v3370_v18, %v3371_v55  ;;  %v3503_v11 = vcombine.low %v3478_v30, %v3490_v29  ;;  %v3440_v8 = vadd.f32 %v5502_v42, %v3417_v60 }
 0x28e   : > { %v3441_v20 = vadd.f32 %v5502_v42, %v3418_v33  ;;  %v3515_v26 = vunpack.c.0.s8 %v3514_v21 }
 0x28f   : > { %v3419_v12 = vmax.f32 %v2102_v4, %v3363_v61  ;;  %v3420_v35 = vmax.f32 %v2111_v9, %v3372_v48  ;;  %v3510_v23 = vrot.slane %v3503_v11, %v5411_v40 }
 0x290   : > { %v3479_v49 = vrot.slane %v3441_v20, 7 }
 0x291   : > { %v3442_v17 = vadd.f32 %v5502_v42, %v3419_v12  ;;  %v3443_v51 = vadd.f32 %v5502_v42, %v3420_v35  ;;  %v3518_v42 = vsub.s32 %v3515_v26, %v5408_v7 }
 0x292   : > { %v3480_v50 = vsel %vm3465_vm5, %v3479_v49, %v3440_v8 }
 0x293   : > { %v3481_v10 = vrot.slane %v3442_v17, 6  ;;  %v3483_v52 = vrot.slane %v3443_v51, 5 }
 0x295   : > { %v3482_v0 = vsel %vm3468_vm6, %v3481_v10, %v3480_v50 }
 0x296   : > { %v3484_v19 = vsel %vm3471_vm7, %v3483_v52, %v3482_v0 }
 0x297   : > { %v3495_v27 = vcombine.low %v3472_v2, %v3484_v19 }
 0x299   : > { %v3502_v39 = vrot.slane %v3495_v27, %v5411_v40 }
 0x29b   : > { %v3512_v15 = vcombine.high %v3502_v39, %v3510_v23  ;;  %v3511_v5 = vcombine.low %v3502_v39, %v3510_v23 }
 0x29d   : > { %v3526_v28 = vrot.slane %v3512_v15, %v3518_v42  ;;  %v3519_v37 = vrot.slane %v3511_v5, %v3518_v42 }
 0x29f   : > { %3534 = vrot.lane.b32.xlu1 %v3526_v28, %s4550_s6  ;;  %v3527_v31 = vcombine.high %v3519_v37, %v4551_v24  ;;  %v3528_v58 = vcombine.high %v3526_v28, %v4551_v24  ;;  %s4456_s6 = scalar_lea.vmem %s4455_s5, 128 }
 0x2a0   : > { %p4458_p4 = scmp.lt.s32.totalorder %s4456_s6, %s4450_s16 }
 0x2a1   : > { %3530 = vrot.lane.b32.xlu0 %v3527_v31, %s4546_s11 }
 0x2a2   : > { %p4459_p5 = por %p4458_p4, %p4457_p2 }
 0x2a4   : > { %p4460_p6 = pnand %p4459_p5, %p4453_p1 }
 0x2a5   : > { %3538 = vrot.lane.b32.xlu0 %v3528_v58, %s4552_s7 }
 0x311   : > { %v3535_v46 = vpop.permute.xlu1 %3534 }
 0x313   : > { %v3531_v40 = vpop.permute.xlu0 %3530 }
 0x314   : > { %v3541_v7 = vsel %vm369_vm2, %v3519_v37, %v3531_v40 }
 0x315   : > { %v3543_v56 = vsel %vm3542_vm8, %v3541_v7, %v3535_v46 }
 0x317   : > { %v3539_v47 = vpop.permute.xlu0 %3538 }
 0x318   : > { %v3545_v6 = vsel %vm3544_vm9, %v3543_v56, %v3539_v47 }
 0x319   : > { %3547 = vst.msk [vmem:[%s177_s24] sm:$0xf] %vm3546_vm10, %v3545_v6 }
 0x31a   : > { %4463 = shalt.err (!%p4460_p6)
}
 0x31b   : > { %s4464_s7 = scalar_lea.hbm %s5722_s29, 64  ;;  %s4468_s10 = scalar_lea.hbm %s5778_s3, 512 }
 0x31c   : > { %p4465_p7 = scmp.ne.s32.totalorder %s5722_s29, %s4464_s7  ;;  %p4469_p11 = scmp.lt.u32.totalorder %s5722_s29, %s5778_s3 }
 0x31d   : > { %p4470_p12 = scmp.lt.u32.totalorder %s4468_s10, %s4464_s7  ;;  %p4472_p0 = scmp.lt.u32.totalorder %s4464_s7, %s5722_s29 }
 0x31e   : > { %p4466_p9 = pnand %p4465_p7, %p4625_p3 }
 0x31f   : > { %p4471_p13 = por %p4470_p12, %p4469_p11 }
 0x320   : > { %p4467_p10 = pneg %p4466_p9 }
 0x321   : > { %p4473_p1 = por %p4472_p0, %p4471_p13 }
 0x323   : > { %p4474_p2 = pnand %p4473_p1, %p4467_p10 }
 0x325   : > { %4477 = shalt.err (!%p4474_p2)
}
 0x326   : > { %4323 = dma.vmem_to_hbm [thread:$0]  (%p4625_p3), %s5724_s27, 64, %s5722_s29, %s3549_s15  }
 0x327 PF: > { %p4329_p4 = scmp.ge.s32.totalorder %s4544_s19, 2  ;;  %s3576_s24 = sand.u32 1, %s4516_s12  }
 0x328   : > { %s3577_s11 = scalar_lea.sflag [#allocation3], %s3576_s24 }
 0x329   : > { %p4326_p5 = pnand %p4329_p4, %p4634_p8 }
 0x32b   : > { %4511 = dma.done.wait (!%p4326_p5), %s3577_s11, 64  }
 0x32c   : > { %4513 = vsyncadd (!%p4326_p5), %s3577_s11, 4294967232  ;;  %s16_s19 = sadd.s32 1, %s4544_s19   ;;  %s5790_s12 = smov %s4520_s13 }
 0x32d   : > { %p13_p6 = scmp.ge.s32.totalorder %s16_s19, 10   ;;  %s5791_s13 = smov %s4524_s14 }
 0x32e   : > { %s5792_s14 = smov %s4643_s30  ;;  %s5793_s15 = smov %s4536_s17 }
 0x32f   : > { %s5794_s16 = smov %s4540_s18  ;;  %s5795_s17 = smov %s5798_s22 }
 0x330   : > { %s5796_s18 = smov %s5802_s23  ;;  %15 = sbr.rel (!%p13_p6) target bundleno = 5 (0x5), region = 79 }
 0x337   :  { %3582 = vsyncpa [#allocation3], 1 }
 0x338   :  { %3584 = vsyncpa [#allocation3 + $0x1], 1 }

</bundles_post_ra>
